<compile_context>
chip_gen: v5e
topology: v5e:2x2
jax: 0.10.0
libtpu: 0.0.40
codegen_flags: <defaults>
</compile_context>

<pallas_src>
import jax
import jax.numpy as jnp
import numpy as np
from jax import lax
from jax.experimental import pallas as pl
from jax.experimental.pallas import tpu as pltpu


# --------------------------------- fused kernel ---------------------------------
def _lenet_kernel(x_ref, w1_ref, w2_ref, s1_ref, s2_ref, b1_ref, b2_ref,
                  wf1_ref, bf1_ref, wf2_ref, bf2_ref, wf3_ref, bf3_ref, o_ref):
    f32 = jnp.float32
    x = x_ref[0]                                        # (32, 96) = [h, w*3+cin]

    # ---- conv1 (5x5, 3->6) + bias + ReLU + 2x2/2 max pool, all on-chip ----
    a0 = jnp.zeros((28, 84), f32)                       # [ho, wp*6+co], pool px=0
    a1 = jnp.zeros((28, 84), f32)                       # pool px=1
    for dy in range(5):                                 # static, unrolled
        xs = x[dy:dy + 28, :]                           # (28, 96) contiguous slice
        a0 = a0 + jnp.dot(xs, w1_ref[2 * dy], preferred_element_type=f32)
        a1 = a1 + jnp.dot(xs, w1_ref[2 * dy + 1], preferred_element_type=f32)
    h = jnp.maximum(a0, a1)                             # W-direction pool
    h = jnp.maximum(jnp.dot(s1_ref[0], h, preferred_element_type=f32),
                    jnp.dot(s1_ref[1], h, preferred_element_type=f32))  # (14, 84)
    h = jnp.maximum(h + b1_ref[...], 0.0)               # bias + ReLU once, post-max

    # ---- conv2 (5x5, 6->16) + bias + ReLU + 2x2/2 max pool ----
    a0 = jnp.zeros((10, 80), f32)                       # [ho, wp*16+co]
    a1 = jnp.zeros((10, 80), f32)
    for dy in range(5):
        hs = h[dy:dy + 10, :]                           # (10, 84)
        a0 = a0 + jnp.dot(hs, w2_ref[2 * dy], preferred_element_type=f32)
        a1 = a1 + jnp.dot(hs, w2_ref[2 * dy + 1], preferred_element_type=f32)
    g = jnp.maximum(a0, a1)
    g = jnp.maximum(jnp.dot(s2_ref[0], g, preferred_element_type=f32),
                    jnp.dot(s2_ref[1], g, preferred_element_type=f32))  # (5, 80)
    g = jnp.maximum(g + b2_ref[...], 0.0)               # [hp, wp*16+co]

    # ---- fc1 (400->120) without flattening: accumulate over the 5 pooled rows ----
    f = jnp.dot(g[0:1, :], wf1_ref[0], preferred_element_type=f32)
    for hp in range(1, 5):
        f = f + jnp.dot(g[hp:hp + 1, :], wf1_ref[hp], preferred_element_type=f32)
    f = jnp.maximum(f + bf1_ref[...], 0.0)              # (1, 120)

    # ---- fc2 -> ReLU -> fc3 ----
    f = jnp.maximum(jnp.dot(f, wf2_ref[...], preferred_element_type=f32)
                    + bf2_ref[...], 0.0)                # (1, 84)
    o = jnp.dot(f, wf3_ref[...], preferred_element_type=f32) + bf3_ref[...]
    o_ref[0] = o.astype(o_ref.dtype)                    # (1, 10)


# --------------------------------- call wrapper ----------------------------------
def _const_spec(shape):
    """Whole-array block, same block for every grid step (weights stay resident)."""
    return pl.BlockSpec(shape, lambda n: (0,) * len(shape))


def model_forward(x_nchw, wp):
    """x_nchw: (N, 3, 32, 32) -> logits (N, 10).  One pallas_call, grid over batch."""
    N, C, H, W = x_nchw.shape
    # Only XLA glue left: present each image as a 2-D (H, W*C) slab.
    x2d = jnp.transpose(x_nchw, (0, 2, 3, 1)).reshape(N, H, W * C)   # (N, 32, 96)

    consts = (wp["w1"], wp["w2"], wp["s1"], wp["s2"], wp["b1"], wp["b2"],
              wp["wf1"], wp["bf1"], wp["wf2"], wp["bf2"], wp["wf3"], wp["bf3"])

    out = pl.pallas_call(
        _lenet_kernel,
        grid=(N,),
        in_specs=[pl.BlockSpec((1, H, W * C), lambda n: (n, 0, 0))]
                 + [_const_spec(a.shape) for a in consts],
        out_specs=pl.BlockSpec((1, 1, 10), lambda n: (n, 0, 0)),
        out_shape=jax.ShapeDtypeStruct((N, 1, 10), jnp.float32),
        compiler_params=pltpu.CompilerParams(dimension_semantics=("parallel",)),
    )(x2d, *consts)
    return out.reshape(N, 10)


# ------------------- one-time host-side weight repacking (outside jit) -------------
def _band_conv_weights(w, w_in):
    """w: (Cout, Cin, 5, 5) conv weight -> (10, w_in*Cin, Wp*Cout) banded matrices.

    Index k = dy*2 + px (kernel-row offset dy, W-pool offset px).  Multiplying the
    2-D image rows [h, w*Cin+cin] by mats[k] yields, for every output row ho and
    pooled column wp, the conv contribution of kernel row dy at W offset 2*wp+px.
    """
    w = np.asarray(w, np.float32)
    cout, cin, kh, kw = w.shape
    wo = w_in - kw + 1
    wpool = wo // 2
    mats = np.zeros((kh * 2, w_in * cin, wpool * cout), np.float32)
    for dy in range(kh):
        for px in range(2):
            k = dy * 2 + px
            for p in range(wpool):
                for dx in range(kw):
                    wi = 2 * p + px + dx
                    mats[k, wi * cin:(wi + 1) * cin, p * cout:(p + 1) * cout] = \
                        w[:, :, dy, dx].T
    return jnp.asarray(mats)


def _pool_select(h_out):
    """(2, h_out, 2*h_out) 0/1 row-selection matrices for H-direction 2x2 pooling."""
    s = np.zeros((2, h_out, 2 * h_out), np.float32)
    idx = np.arange(h_out)
    s[0, idx, 2 * idx] = 1.0
    s[1, idx, 2 * idx + 1] = 1.0
    return jnp.asarray(s)


def prepare_params(p):
    # fc1 rows permuted so the kernel can consume the (h, w, c)-ordered pooled map
    # directly (matches torch's x.view(-1, 16*5*5) == (c, h, w) flatten).
    fc1 = (np.asarray(p["fc1_w"], np.float32)
           .reshape(120, 16, 5, 5)          # (out, c, h, w)
           .transpose(2, 3, 1, 0)           # (h, w, c, out)
           .reshape(5, 80, 120))            # (h, w*16+c, out)
    return {
        "w1": _band_conv_weights(p["conv1_w"], 32),            # (10, 96, 84)
        "b1": jnp.tile(p["conv1_b"], 14)[None, :],              # (1, 84)
        "w2": _band_conv_weights(p["conv2_w"], 14),             # (10, 84, 80)
        "b2": jnp.tile(p["conv2_b"], 5)[None, :],               # (1, 80)
        "s1": _pool_select(14),                                  # (2, 14, 28)
        "s2": _pool_select(5),                                   # (2, 5, 10)
        "wf1": jnp.asarray(fc1),                                 # (5, 80, 120)
        "bf1": p["fc1_b"][None, :],
        "wf2": p["fc2_w"].T, "bf2": p["fc2_b"][None, :],
        "wf3": p["fc3_w"].T, "bf3": p["fc3_b"][None, :],
    }


# --------------------------- pure-JAX reference (sanity) ---------------------------
def reference_forward(x, p):
    def conv(x, w, b):
        y = lax.conv_general_dilated(x, w, (1, 1), "VALID",
                                     dimension_numbers=("NCHW", "OIHW", "NCHW"))
        return y + b[None, :, None, None]

    def pool(x):
        N, C, H, W = x.shape
        return x.reshape(N, C, H // 2, 2, W // 2, 2).max(axis=(3, 5))

    y = pool(jnp.maximum(conv(x, p["conv1_w"], p["conv1_b"]), 0.0))
    y = pool(jnp.maximum(conv(y, p["conv2_w"], p["conv2_b"]), 0.0))
    y = y.reshape(y.shape[0], -1)
    y = jnp.maximum(y @ p["fc1_w"].T + p["fc1_b"], 0.0)
    y = jnp.maximum(y @ p["fc2_w"].T + p["fc2_b"], 0.0)
    return y @ p["fc3_w"].T + p["fc3_b"]


# ------------------------------- deterministic init --------------------------------
def init_params(key):
    def uni(k, shape, fan_in):
        bound = 1.0 / jnp.sqrt(jnp.float32(fan_in))
        return jax.random.uniform(k, shape, jnp.float32, -bound, bound)

    ks = jax.random.split(key, 10)
    return {
        "conv1_w": uni(ks[0], (6, 3, 5, 5), 3 * 5 * 5),
        "conv1_b": uni(ks[1], (6,), 3 * 5 * 5),
        "conv2_w": uni(ks[2], (16, 6, 5, 5), 6 * 5 * 5),
        "conv2_b": uni(ks[3], (16,), 6 * 5 * 5),
        "fc1_w":   uni(ks[4], (120, 400), 400),
        "fc1_b":   uni(ks[5], (120,), 400),
        "fc2_w":   uni(ks[6], (84, 120), 120),
        "fc2_b":   uni(ks[7], (84,), 120),
        "fc3_w":   uni(ks[8], (10, 84), 84),
        "fc3_b":   uni(ks[9], (10,), 84),
    }


if __name__ == "__main__":
    key = jax.random.PRNGKey(0)
    kx, kp = jax.random.split(key)
    # 32x32 spatial is required by fc1's 16*5*5 input; batch kept small (2).
    x = jax.random.normal(kx, (2, 3, 32, 32), jnp.float32)
    params = init_params(kp)
    prepared = prepare_params(params)     # one-time host-side repack, outside jit

    fwd = jax.jit(model_forward)
    out = jax.block_until_ready(fwd(x, prepared))

    ref = reference_forward(x, params)
    assert out.shape == (2, 10), out.shape
    err = float(jnp.max(jnp.abs(out - ref)))
    assert jnp.allclose(out, ref, rtol=1e-3, atol=1e-3), f"mismatch: max abs err {err}"
    print("KERNEL_OK")
</pallas_src>

<mosaic_0001>
module attributes {stable_mosaic.version = 11 : i64} {
  func.func @_lenet_kernel(%arg0: i32, %arg1: memref<1x32x96xf32, #tpu.memory_space<vmem>>, %arg2: memref<10x96x84xf32, #tpu.memory_space<vmem>>, %arg3: memref<10x84x80xf32, #tpu.memory_space<vmem>>, %arg4: memref<2x14x28xf32, #tpu.memory_space<vmem>>, %arg5: memref<2x5x10xf32, #tpu.memory_space<vmem>>, %arg6: memref<1x84xf32, #tpu.memory_space<vmem>>, %arg7: memref<1x80xf32, #tpu.memory_space<vmem>>, %arg8: memref<5x80x120xf32, #tpu.memory_space<vmem>>, %arg9: memref<1x120xf32, #tpu.memory_space<vmem>>, %arg10: memref<120x84xf32, #tpu.memory_space<vmem>>, %arg11: memref<1x84xf32, #tpu.memory_space<vmem>>, %arg12: memref<84x10xf32, #tpu.memory_space<vmem>>, %arg13: memref<1x10xf32, #tpu.memory_space<vmem>>, %arg14: memref<1x1x10xf32, #tpu.memory_space<vmem>>) attributes {dimension_semantics = [#tpu.dimension_semantics<parallel>], iteration_bounds = array<i64: 2>, scalar_prefetch = 0 : i64, scratch_operands = 0 : i64, tpu.core_type = #tpu.core_type<tc>, window_params = [{transform_indices = @transform_0, window_bounds = array<i64: 1, 32, 96>}, {pipeline_mode = #tpu.pipeline_mode<synchronous>, transform_indices = @transform_1, window_bounds = array<i64: 10, 96, 84>}, {pipeline_mode = #tpu.pipeline_mode<synchronous>, transform_indices = @transform_2, window_bounds = array<i64: 10, 84, 80>}, {pipeline_mode = #tpu.pipeline_mode<synchronous>, transform_indices = @transform_3, window_bounds = array<i64: 2, 14, 28>}, {pipeline_mode = #tpu.pipeline_mode<synchronous>, transform_indices = @transform_4, window_bounds = array<i64: 2, 5, 10>}, {pipeline_mode = #tpu.pipeline_mode<synchronous>, transform_indices = @transform_5, window_bounds = array<i64: 1, 84>}, {pipeline_mode = #tpu.pipeline_mode<synchronous>, transform_indices = @transform_6, window_bounds = array<i64: 1, 80>}, {pipeline_mode = #tpu.pipeline_mode<synchronous>, transform_indices = @transform_7, window_bounds = array<i64: 5, 80, 120>}, {pipeline_mode = #tpu.pipeline_mode<synchronous>, transform_indices = @transform_8, window_bounds = array<i64: 1, 120>}, {pipeline_mode = #tpu.pipeline_mode<synchronous>, transform_indices = @transform_9, window_bounds = array<i64: 120, 84>}, {pipeline_mode = #tpu.pipeline_mode<synchronous>, transform_indices = @transform_10, window_bounds = array<i64: 1, 84>}, {pipeline_mode = #tpu.pipeline_mode<synchronous>, transform_indices = @transform_11, window_bounds = array<i64: 84, 10>}, {pipeline_mode = #tpu.pipeline_mode<synchronous>, transform_indices = @transform_12, window_bounds = array<i64: 1, 10>}, {transform_indices = @transform_13, window_bounds = array<i64: 1, 1, 10>}]} {
    %c0 = arith.constant 0 : index
    %c0_0 = arith.constant 0 : index
    %c0_1 = arith.constant 0 : index
    %0 = vector.load %arg1[%c0, %c0_0, %c0_1] : memref<1x32x96xf32, #tpu.memory_space<vmem>>, vector<1x32x96xf32>
    %1 = vector.shape_cast %0 : vector<1x32x96xf32> to vector<32x96xf32>
    %cst = arith.constant 0.000000e+00 : f32
    %2 = vector.broadcast %cst : f32 to vector<28x84xf32>
    %cst_2 = arith.constant 0.000000e+00 : f32
    %3 = vector.broadcast %cst_2 : f32 to vector<28x84xf32>
    %4 = vector.extract_strided_slice %1 {offsets = [0, 0], sizes = [28, 96], strides = [1, 1]} : vector<32x96xf32> to vector<28x96xf32>
    %c0_3 = arith.constant 0 : index
    %c0_4 = arith.constant 0 : index
    %c0_5 = arith.constant 0 : index
    %5 = vector.load %arg2[%c0_3, %c0_4, %c0_5] : memref<10x96x84xf32, #tpu.memory_space<vmem>>, vector<1x96x84xf32>
    %6 = vector.shape_cast %5 : vector<1x96x84xf32> to vector<96x84xf32>
    %cst_6 = arith.constant dense<0.000000e+00> : vector<28x84xf32>
    %7 = tpu.matmul %4, %6, %cst_6 {dimension_numbers = #tpu.dot_dimension_numbers<[1], [0], [0], [1], [0, 0, 1, 1], [], []>} : vector<28x96xf32>, vector<96x84xf32>, vector<28x84xf32> -> vector<28x84xf32>
    %8 = arith.addf %2, %7 : vector<28x84xf32>
    %c1 = arith.constant 1 : index
    %c0_7 = arith.constant 0 : index
    %c0_8 = arith.constant 0 : index
    %9 = vector.load %arg2[%c1, %c0_7, %c0_8] : memref<10x96x84xf32, #tpu.memory_space<vmem>>, vector<1x96x84xf32>
    %10 = vector.shape_cast %9 : vector<1x96x84xf32> to vector<96x84xf32>
    %cst_9 = arith.constant dense<0.000000e+00> : vector<28x84xf32>
    %11 = tpu.matmul %4, %10, %cst_9 {dimension_numbers = #tpu.dot_dimension_numbers<[1], [0], [0], [1], [0, 0, 1, 1], [], []>} : vector<28x96xf32>, vector<96x84xf32>, vector<28x84xf32> -> vector<28x84xf32>
    %12 = arith.addf %3, %11 : vector<28x84xf32>
    %13 = vector.extract_strided_slice %1 {offsets = [1, 0], sizes = [28, 96], strides = [1, 1]} : vector<32x96xf32> to vector<28x96xf32>
    %c2 = arith.constant 2 : index
    %c0_10 = arith.constant 0 : index
    %c0_11 = arith.constant 0 : index
    %14 = vector.load %arg2[%c2, %c0_10, %c0_11] : memref<10x96x84xf32, #tpu.memory_space<vmem>>, vector<1x96x84xf32>
    %15 = vector.shape_cast %14 : vector<1x96x84xf32> to vector<96x84xf32>
    %cst_12 = arith.constant dense<0.000000e+00> : vector<28x84xf32>
    %16 = tpu.matmul %13, %15, %cst_12 {dimension_numbers = #tpu.dot_dimension_numbers<[1], [0], [0], [1], [0, 0, 1, 1], [], []>} : vector<28x96xf32>, vector<96x84xf32>, vector<28x84xf32> -> vector<28x84xf32>
    %17 = arith.addf %8, %16 : vector<28x84xf32>
    %c3 = arith.constant 3 : index
    %c0_13 = arith.constant 0 : index
    %c0_14 = arith.constant 0 : index
    %18 = vector.load %arg2[%c3, %c0_13, %c0_14] : memref<10x96x84xf32, #tpu.memory_space<vmem>>, vector<1x96x84xf32>
    %19 = vector.shape_cast %18 : vector<1x96x84xf32> to vector<96x84xf32>
    %cst_15 = arith.constant dense<0.000000e+00> : vector<28x84xf32>
    %20 = tpu.matmul %13, %19, %cst_15 {dimension_numbers = #tpu.dot_dimension_numbers<[1], [0], [0], [1], [0, 0, 1, 1], [], []>} : vector<28x96xf32>, vector<96x84xf32>, vector<28x84xf32> -> vector<28x84xf32>
    %21 = arith.addf %12, %20 : vector<28x84xf32>
    %22 = vector.extract_strided_slice %1 {offsets = [2, 0], sizes = [28, 96], strides = [1, 1]} : vector<32x96xf32> to vector<28x96xf32>
    %c4 = arith.constant 4 : index
    %c0_16 = arith.constant 0 : index
    %c0_17 = arith.constant 0 : index
    %23 = vector.load %arg2[%c4, %c0_16, %c0_17] : memref<10x96x84xf32, #tpu.memory_space<vmem>>, vector<1x96x84xf32>
    %24 = vector.shape_cast %23 : vector<1x96x84xf32> to vector<96x84xf32>
    %cst_18 = arith.constant dense<0.000000e+00> : vector<28x84xf32>
    %25 = tpu.matmul %22, %24, %cst_18 {dimension_numbers = #tpu.dot_dimension_numbers<[1], [0], [0], [1], [0, 0, 1, 1], [], []>} : vector<28x96xf32>, vector<96x84xf32>, vector<28x84xf32> -> vector<28x84xf32>
    %26 = arith.addf %17, %25 : vector<28x84xf32>
    %c5 = arith.constant 5 : index
    %c0_19 = arith.constant 0 : index
    %c0_20 = arith.constant 0 : index
    %27 = vector.load %arg2[%c5, %c0_19, %c0_20] : memref<10x96x84xf32, #tpu.memory_space<vmem>>, vector<1x96x84xf32>
    %28 = vector.shape_cast %27 : vector<1x96x84xf32> to vector<96x84xf32>
    %cst_21 = arith.constant dense<0.000000e+00> : vector<28x84xf32>
    %29 = tpu.matmul %22, %28, %cst_21 {dimension_numbers = #tpu.dot_dimension_numbers<[1], [0], [0], [1], [0, 0, 1, 1], [], []>} : vector<28x96xf32>, vector<96x84xf32>, vector<28x84xf32> -> vector<28x84xf32>
    %30 = arith.addf %21, %29 : vector<28x84xf32>
    %31 = vector.extract_strided_slice %1 {offsets = [3, 0], sizes = [28, 96], strides = [1, 1]} : vector<32x96xf32> to vector<28x96xf32>
    %c6 = arith.constant 6 : index
    %c0_22 = arith.constant 0 : index
    %c0_23 = arith.constant 0 : index
    %32 = vector.load %arg2[%c6, %c0_22, %c0_23] : memref<10x96x84xf32, #tpu.memory_space<vmem>>, vector<1x96x84xf32>
    %33 = vector.shape_cast %32 : vector<1x96x84xf32> to vector<96x84xf32>
    %cst_24 = arith.constant dense<0.000000e+00> : vector<28x84xf32>
    %34 = tpu.matmul %31, %33, %cst_24 {dimension_numbers = #tpu.dot_dimension_numbers<[1], [0], [0], [1], [0, 0, 1, 1], [], []>} : vector<28x96xf32>, vector<96x84xf32>, vector<28x84xf32> -> vector<28x84xf32>
    %35 = arith.addf %26, %34 : vector<28x84xf32>
    %c7 = arith.constant 7 : index
    %c0_25 = arith.constant 0 : index
    %c0_26 = arith.constant 0 : index
    %36 = vector.load %arg2[%c7, %c0_25, %c0_26] : memref<10x96x84xf32, #tpu.memory_space<vmem>>, vector<1x96x84xf32>
    %37 = vector.shape_cast %36 : vector<1x96x84xf32> to vector<96x84xf32>
    %cst_27 = arith.constant dense<0.000000e+00> : vector<28x84xf32>
    %38 = tpu.matmul %31, %37, %cst_27 {dimension_numbers = #tpu.dot_dimension_numbers<[1], [0], [0], [1], [0, 0, 1, 1], [], []>} : vector<28x96xf32>, vector<96x84xf32>, vector<28x84xf32> -> vector<28x84xf32>
    %39 = arith.addf %30, %38 : vector<28x84xf32>
    %40 = vector.extract_strided_slice %1 {offsets = [4, 0], sizes = [28, 96], strides = [1, 1]} : vector<32x96xf32> to vector<28x96xf32>
    %c8 = arith.constant 8 : index
    %c0_28 = arith.constant 0 : index
    %c0_29 = arith.constant 0 : index
    %41 = vector.load %arg2[%c8, %c0_28, %c0_29] : memref<10x96x84xf32, #tpu.memory_space<vmem>>, vector<1x96x84xf32>
    %42 = vector.shape_cast %41 : vector<1x96x84xf32> to vector<96x84xf32>
    %cst_30 = arith.constant dense<0.000000e+00> : vector<28x84xf32>
    %43 = tpu.matmul %40, %42, %cst_30 {dimension_numbers = #tpu.dot_dimension_numbers<[1], [0], [0], [1], [0, 0, 1, 1], [], []>} : vector<28x96xf32>, vector<96x84xf32>, vector<28x84xf32> -> vector<28x84xf32>
    %44 = arith.addf %35, %43 : vector<28x84xf32>
    %c9 = arith.constant 9 : index
    %c0_31 = arith.constant 0 : index
    %c0_32 = arith.constant 0 : index
    %45 = vector.load %arg2[%c9, %c0_31, %c0_32] : memref<10x96x84xf32, #tpu.memory_space<vmem>>, vector<1x96x84xf32>
    %46 = vector.shape_cast %45 : vector<1x96x84xf32> to vector<96x84xf32>
    %cst_33 = arith.constant dense<0.000000e+00> : vector<28x84xf32>
    %47 = tpu.matmul %40, %46, %cst_33 {dimension_numbers = #tpu.dot_dimension_numbers<[1], [0], [0], [1], [0, 0, 1, 1], [], []>} : vector<28x96xf32>, vector<96x84xf32>, vector<28x84xf32> -> vector<28x84xf32>
    %48 = arith.addf %39, %47 : vector<28x84xf32>
    %49 = arith.maximumf %44, %48 : vector<28x84xf32>
    %c0_34 = arith.constant 0 : index
    %c0_35 = arith.constant 0 : index
    %c0_36 = arith.constant 0 : index
    %50 = vector.load %arg4[%c0_34, %c0_35, %c0_36] : memref<2x14x28xf32, #tpu.memory_space<vmem>>, vector<1x14x28xf32>
    %51 = vector.shape_cast %50 : vector<1x14x28xf32> to vector<14x28xf32>
    %cst_37 = arith.constant dense<0.000000e+00> : vector<14x84xf32>
    %52 = tpu.matmul %51, %49, %cst_37 {dimension_numbers = #tpu.dot_dimension_numbers<[1], [0], [0], [1], [0, 0, 1, 1], [], []>} : vector<14x28xf32>, vector<28x84xf32>, vector<14x84xf32> -> vector<14x84xf32>
    %c1_38 = arith.constant 1 : index
    %c0_39 = arith.constant 0 : index
    %c0_40 = arith.constant 0 : index
    %53 = vector.load %arg4[%c1_38, %c0_39, %c0_40] : memref<2x14x28xf32, #tpu.memory_space<vmem>>, vector<1x14x28xf32>
    %54 = vector.shape_cast %53 : vector<1x14x28xf32> to vector<14x28xf32>
    %cst_41 = arith.constant dense<0.000000e+00> : vector<14x84xf32>
    %55 = tpu.matmul %54, %49, %cst_41 {dimension_numbers = #tpu.dot_dimension_numbers<[1], [0], [0], [1], [0, 0, 1, 1], [], []>} : vector<14x28xf32>, vector<28x84xf32>, vector<14x84xf32> -> vector<14x84xf32>
    %56 = arith.maximumf %52, %55 : vector<14x84xf32>
    %c0_42 = arith.constant 0 : index
    %c0_43 = arith.constant 0 : index
    %57 = vector.load %arg6[%c0_42, %c0_43] : memref<1x84xf32, #tpu.memory_space<vmem>>, vector<1x84xf32>
    %58 = vector.broadcast %57 : vector<1x84xf32> to vector<14x84xf32>
    %59 = arith.addf %56, %58 : vector<14x84xf32>
    %cst_44 = arith.constant 0.000000e+00 : f32
    %60 = vector.broadcast %cst_44 : f32 to vector<14x84xf32>
    %61 = arith.maximumf %59, %60 : vector<14x84xf32>
    %cst_45 = arith.constant 0.000000e+00 : f32
    %62 = vector.broadcast %cst_45 : f32 to vector<10x80xf32>
    %cst_46 = arith.constant 0.000000e+00 : f32
    %63 = vector.broadcast %cst_46 : f32 to vector<10x80xf32>
    %64 = vector.extract_strided_slice %61 {offsets = [0, 0], sizes = [10, 84], strides = [1, 1]} : vector<14x84xf32> to vector<10x84xf32>
    %c0_47 = arith.constant 0 : index
    %c0_48 = arith.constant 0 : index
    %c0_49 = arith.constant 0 : index
    %65 = vector.load %arg3[%c0_47, %c0_48, %c0_49] : memref<10x84x80xf32, #tpu.memory_space<vmem>>, vector<1x84x80xf32>
    %66 = vector.shape_cast %65 : vector<1x84x80xf32> to vector<84x80xf32>
    %cst_50 = arith.constant dense<0.000000e+00> : vector<10x80xf32>
    %67 = tpu.matmul %64, %66, %cst_50 {dimension_numbers = #tpu.dot_dimension_numbers<[1], [0], [0], [1], [0, 0, 1, 1], [], []>} : vector<10x84xf32>, vector<84x80xf32>, vector<10x80xf32> -> vector<10x80xf32>
    %68 = arith.addf %62, %67 : vector<10x80xf32>
    %c1_51 = arith.constant 1 : index
    %c0_52 = arith.constant 0 : index
    %c0_53 = arith.constant 0 : index
    %69 = vector.load %arg3[%c1_51, %c0_52, %c0_53] : memref<10x84x80xf32, #tpu.memory_space<vmem>>, vector<1x84x80xf32>
    %70 = vector.shape_cast %69 : vector<1x84x80xf32> to vector<84x80xf32>
    %cst_54 = arith.constant dense<0.000000e+00> : vector<10x80xf32>
    %71 = tpu.matmul %64, %70, %cst_54 {dimension_numbers = #tpu.dot_dimension_numbers<[1], [0], [0], [1], [0, 0, 1, 1], [], []>} : vector<10x84xf32>, vector<84x80xf32>, vector<10x80xf32> -> vector<10x80xf32>
    %72 = arith.addf %63, %71 : vector<10x80xf32>
    %73 = vector.extract_strided_slice %61 {offsets = [1, 0], sizes = [10, 84], strides = [1, 1]} : vector<14x84xf32> to vector<10x84xf32>
    %c2_55 = arith.constant 2 : index
    %c0_56 = arith.constant 0 : index
    %c0_57 = arith.constant 0 : index
    %74 = vector.load %arg3[%c2_55, %c0_56, %c0_57] : memref<10x84x80xf32, #tpu.memory_space<vmem>>, vector<1x84x80xf32>
    %75 = vector.shape_cast %74 : vector<1x84x80xf32> to vector<84x80xf32>
    %cst_58 = arith.constant dense<0.000000e+00> : vector<10x80xf32>
    %76 = tpu.matmul %73, %75, %cst_58 {dimension_numbers = #tpu.dot_dimension_numbers<[1], [0], [0], [1], [0, 0, 1, 1], [], []>} : vector<10x84xf32>, vector<84x80xf32>, vector<10x80xf32> -> vector<10x80xf32>
    %77 = arith.addf %68, %76 : vector<10x80xf32>
    %c3_59 = arith.constant 3 : index
    %c0_60 = arith.constant 0 : index
    %c0_61 = arith.constant 0 : index
    %78 = vector.load %arg3[%c3_59, %c0_60, %c0_61] : memref<10x84x80xf32, #tpu.memory_space<vmem>>, vector<1x84x80xf32>
    %79 = vector.shape_cast %78 : vector<1x84x80xf32> to vector<84x80xf32>
    %cst_62 = arith.constant dense<0.000000e+00> : vector<10x80xf32>
    %80 = tpu.matmul %73, %79, %cst_62 {dimension_numbers = #tpu.dot_dimension_numbers<[1], [0], [0], [1], [0, 0, 1, 1], [], []>} : vector<10x84xf32>, vector<84x80xf32>, vector<10x80xf32> -> vector<10x80xf32>
    %81 = arith.addf %72, %80 : vector<10x80xf32>
    %82 = vector.extract_strided_slice %61 {offsets = [2, 0], sizes = [10, 84], strides = [1, 1]} : vector<14x84xf32> to vector<10x84xf32>
    %c4_63 = arith.constant 4 : index
    %c0_64 = arith.constant 0 : index
    %c0_65 = arith.constant 0 : index
    %83 = vector.load %arg3[%c4_63, %c0_64, %c0_65] : memref<10x84x80xf32, #tpu.memory_space<vmem>>, vector<1x84x80xf32>
    %84 = vector.shape_cast %83 : vector<1x84x80xf32> to vector<84x80xf32>
    %cst_66 = arith.constant dense<0.000000e+00> : vector<10x80xf32>
    %85 = tpu.matmul %82, %84, %cst_66 {dimension_numbers = #tpu.dot_dimension_numbers<[1], [0], [0], [1], [0, 0, 1, 1], [], []>} : vector<10x84xf32>, vector<84x80xf32>, vector<10x80xf32> -> vector<10x80xf32>
    %86 = arith.addf %77, %85 : vector<10x80xf32>
    %c5_67 = arith.constant 5 : index
    %c0_68 = arith.constant 0 : index
    %c0_69 = arith.constant 0 : index
    %87 = vector.load %arg3[%c5_67, %c0_68, %c0_69] : memref<10x84x80xf32, #tpu.memory_space<vmem>>, vector<1x84x80xf32>
    %88 = vector.shape_cast %87 : vector<1x84x80xf32> to vector<84x80xf32>
    %cst_70 = arith.constant dense<0.000000e+00> : vector<10x80xf32>
    %89 = tpu.matmul %82, %88, %cst_70 {dimension_numbers = #tpu.dot_dimension_numbers<[1], [0], [0], [1], [0, 0, 1, 1], [], []>} : vector<10x84xf32>, vector<84x80xf32>, vector<10x80xf32> -> vector<10x80xf32>
    %90 = arith.addf %81, %89 : vector<10x80xf32>
    %91 = vector.extract_strided_slice %61 {offsets = [3, 0], sizes = [10, 84], strides = [1, 1]} : vector<14x84xf32> to vector<10x84xf32>
    %c6_71 = arith.constant 6 : index
    %c0_72 = arith.constant 0 : index
    %c0_73 = arith.constant 0 : index
    %92 = vector.load %arg3[%c6_71, %c0_72, %c0_73] : memref<10x84x80xf32, #tpu.memory_space<vmem>>, vector<1x84x80xf32>
    %93 = vector.shape_cast %92 : vector<1x84x80xf32> to vector<84x80xf32>
    %cst_74 = arith.constant dense<0.000000e+00> : vector<10x80xf32>
    %94 = tpu.matmul %91, %93, %cst_74 {dimension_numbers = #tpu.dot_dimension_numbers<[1], [0], [0], [1], [0, 0, 1, 1], [], []>} : vector<10x84xf32>, vector<84x80xf32>, vector<10x80xf32> -> vector<10x80xf32>
    %95 = arith.addf %86, %94 : vector<10x80xf32>
    %c7_75 = arith.constant 7 : index
    %c0_76 = arith.constant 0 : index
    %c0_77 = arith.constant 0 : index
    %96 = vector.load %arg3[%c7_75, %c0_76, %c0_77] : memref<10x84x80xf32, #tpu.memory_space<vmem>>, vector<1x84x80xf32>
    %97 = vector.shape_cast %96 : vector<1x84x80xf32> to vector<84x80xf32>
    %cst_78 = arith.constant dense<0.000000e+00> : vector<10x80xf32>
    %98 = tpu.matmul %91, %97, %cst_78 {dimension_numbers = #tpu.dot_dimension_numbers<[1], [0], [0], [1], [0, 0, 1, 1], [], []>} : vector<10x84xf32>, vector<84x80xf32>, vector<10x80xf32> -> vector<10x80xf32>
    %99 = arith.addf %90, %98 : vector<10x80xf32>
    %100 = vector.extract_strided_slice %61 {offsets = [4, 0], sizes = [10, 84], strides = [1, 1]} : vector<14x84xf32> to vector<10x84xf32>
    %c8_79 = arith.constant 8 : index
    %c0_80 = arith.constant 0 : index
    %c0_81 = arith.constant 0 : index
    %101 = vector.load %arg3[%c8_79, %c0_80, %c0_81] : memref<10x84x80xf32, #tpu.memory_space<vmem>>, vector<1x84x80xf32>
    %102 = vector.shape_cast %101 : vector<1x84x80xf32> to vector<84x80xf32>
    %cst_82 = arith.constant dense<0.000000e+00> : vector<10x80xf32>
    %103 = tpu.matmul %100, %102, %cst_82 {dimension_numbers = #tpu.dot_dimension_numbers<[1], [0], [0], [1], [0, 0, 1, 1], [], []>} : vector<10x84xf32>, vector<84x80xf32>, vector<10x80xf32> -> vector<10x80xf32>
    %104 = arith.addf %95, %103 : vector<10x80xf32>
    %c9_83 = arith.constant 9 : index
    %c0_84 = arith.constant 0 : index
    %c0_85 = arith.constant 0 : index
    %105 = vector.load %arg3[%c9_83, %c0_84, %c0_85] : memref<10x84x80xf32, #tpu.memory_space<vmem>>, vector<1x84x80xf32>
    %106 = vector.shape_cast %105 : vector<1x84x80xf32> to vector<84x80xf32>
    %cst_86 = arith.constant dense<0.000000e+00> : vector<10x80xf32>
    %107 = tpu.matmul %100, %106, %cst_86 {dimension_numbers = #tpu.dot_dimension_numbers<[1], [0], [0], [1], [0, 0, 1, 1], [], []>} : vector<10x84xf32>, vector<84x80xf32>, vector<10x80xf32> -> vector<10x80xf32>
    %108 = arith.addf %99, %107 : vector<10x80xf32>
    %109 = arith.maximumf %104, %108 : vector<10x80xf32>
    %c0_87 = arith.constant 0 : index
    %c0_88 = arith.constant 0 : index
    %c0_89 = arith.constant 0 : index
    %110 = vector.load %arg5[%c0_87, %c0_88, %c0_89] : memref<2x5x10xf32, #tpu.memory_space<vmem>>, vector<1x5x10xf32>
    %111 = vector.shape_cast %110 : vector<1x5x10xf32> to vector<5x10xf32>
    %cst_90 = arith.constant dense<0.000000e+00> : vector<5x80xf32>
    %112 = tpu.matmul %111, %109, %cst_90 {dimension_numbers = #tpu.dot_dimension_numbers<[1], [0], [0], [1], [0, 0, 1, 1], [], []>} : vector<5x10xf32>, vector<10x80xf32>, vector<5x80xf32> -> vector<5x80xf32>
    %c1_91 = arith.constant 1 : index
    %c0_92 = arith.constant 0 : index
    %c0_93 = arith.constant 0 : index
    %113 = vector.load %arg5[%c1_91, %c0_92, %c0_93] : memref<2x5x10xf32, #tpu.memory_space<vmem>>, vector<1x5x10xf32>
    %114 = vector.shape_cast %113 : vector<1x5x10xf32> to vector<5x10xf32>
    %cst_94 = arith.constant dense<0.000000e+00> : vector<5x80xf32>
    %115 = tpu.matmul %114, %109, %cst_94 {dimension_numbers = #tpu.dot_dimension_numbers<[1], [0], [0], [1], [0, 0, 1, 1], [], []>} : vector<5x10xf32>, vector<10x80xf32>, vector<5x80xf32> -> vector<5x80xf32>
    %116 = arith.maximumf %112, %115 : vector<5x80xf32>
    %c0_95 = arith.constant 0 : index
    %c0_96 = arith.constant 0 : index
    %117 = vector.load %arg7[%c0_95, %c0_96] : memref<1x80xf32, #tpu.memory_space<vmem>>, vector<1x80xf32>
    %118 = vector.broadcast %117 : vector<1x80xf32> to vector<5x80xf32>
    %119 = arith.addf %116, %118 : vector<5x80xf32>
    %cst_97 = arith.constant 0.000000e+00 : f32
    %120 = vector.broadcast %cst_97 : f32 to vector<5x80xf32>
    %121 = arith.maximumf %119, %120 : vector<5x80xf32>
    %122 = vector.extract_strided_slice %121 {offsets = [0, 0], sizes = [1, 80], strides = [1, 1]} : vector<5x80xf32> to vector<1x80xf32>
    %c0_98 = arith.constant 0 : index
    %c0_99 = arith.constant 0 : index
    %c0_100 = arith.constant 0 : index
    %123 = vector.load %arg8[%c0_98, %c0_99, %c0_100] : memref<5x80x120xf32, #tpu.memory_space<vmem>>, vector<1x80x120xf32>
    %124 = vector.shape_cast %123 : vector<1x80x120xf32> to vector<80x120xf32>
    %cst_101 = arith.constant dense<0.000000e+00> : vector<1x120xf32>
    %125 = tpu.matmul %122, %124, %cst_101 {dimension_numbers = #tpu.dot_dimension_numbers<[1], [0], [0], [1], [0, 0, 1, 1], [], []>} : vector<1x80xf32>, vector<80x120xf32>, vector<1x120xf32> -> vector<1x120xf32>
    %126 = vector.extract_strided_slice %121 {offsets = [1, 0], sizes = [1, 80], strides = [1, 1]} : vector<5x80xf32> to vector<1x80xf32>
    %c1_102 = arith.constant 1 : index
    %c0_103 = arith.constant 0 : index
    %c0_104 = arith.constant 0 : index
    %127 = vector.load %arg8[%c1_102, %c0_103, %c0_104] : memref<5x80x120xf32, #tpu.memory_space<vmem>>, vector<1x80x120xf32>
    %128 = vector.shape_cast %127 : vector<1x80x120xf32> to vector<80x120xf32>
    %cst_105 = arith.constant dense<0.000000e+00> : vector<1x120xf32>
    %129 = tpu.matmul %126, %128, %cst_105 {dimension_numbers = #tpu.dot_dimension_numbers<[1], [0], [0], [1], [0, 0, 1, 1], [], []>} : vector<1x80xf32>, vector<80x120xf32>, vector<1x120xf32> -> vector<1x120xf32>
    %130 = arith.addf %125, %129 : vector<1x120xf32>
    %131 = vector.extract_strided_slice %121 {offsets = [2, 0], sizes = [1, 80], strides = [1, 1]} : vector<5x80xf32> to vector<1x80xf32>
    %c2_106 = arith.constant 2 : index
    %c0_107 = arith.constant 0 : index
    %c0_108 = arith.constant 0 : index
    %132 = vector.load %arg8[%c2_106, %c0_107, %c0_108] : memref<5x80x120xf32, #tpu.memory_space<vmem>>, vector<1x80x120xf32>
    %133 = vector.shape_cast %132 : vector<1x80x120xf32> to vector<80x120xf32>
    %cst_109 = arith.constant dense<0.000000e+00> : vector<1x120xf32>
    %134 = tpu.matmul %131, %133, %cst_109 {dimension_numbers = #tpu.dot_dimension_numbers<[1], [0], [0], [1], [0, 0, 1, 1], [], []>} : vector<1x80xf32>, vector<80x120xf32>, vector<1x120xf32> -> vector<1x120xf32>
    %135 = arith.addf %130, %134 : vector<1x120xf32>
    %136 = vector.extract_strided_slice %121 {offsets = [3, 0], sizes = [1, 80], strides = [1, 1]} : vector<5x80xf32> to vector<1x80xf32>
    %c3_110 = arith.constant 3 : index
    %c0_111 = arith.constant 0 : index
    %c0_112 = arith.constant 0 : index
    %137 = vector.load %arg8[%c3_110, %c0_111, %c0_112] : memref<5x80x120xf32, #tpu.memory_space<vmem>>, vector<1x80x120xf32>
    %138 = vector.shape_cast %137 : vector<1x80x120xf32> to vector<80x120xf32>
    %cst_113 = arith.constant dense<0.000000e+00> : vector<1x120xf32>
    %139 = tpu.matmul %136, %138, %cst_113 {dimension_numbers = #tpu.dot_dimension_numbers<[1], [0], [0], [1], [0, 0, 1, 1], [], []>} : vector<1x80xf32>, vector<80x120xf32>, vector<1x120xf32> -> vector<1x120xf32>
    %140 = arith.addf %135, %139 : vector<1x120xf32>
    %141 = vector.extract_strided_slice %121 {offsets = [4, 0], sizes = [1, 80], strides = [1, 1]} : vector<5x80xf32> to vector<1x80xf32>
    %c4_114 = arith.constant 4 : index
    %c0_115 = arith.constant 0 : index
    %c0_116 = arith.constant 0 : index
    %142 = vector.load %arg8[%c4_114, %c0_115, %c0_116] : memref<5x80x120xf32, #tpu.memory_space<vmem>>, vector<1x80x120xf32>
    %143 = vector.shape_cast %142 : vector<1x80x120xf32> to vector<80x120xf32>
    %cst_117 = arith.constant dense<0.000000e+00> : vector<1x120xf32>
    %144 = tpu.matmul %141, %143, %cst_117 {dimension_numbers = #tpu.dot_dimension_numbers<[1], [0], [0], [1], [0, 0, 1, 1], [], []>} : vector<1x80xf32>, vector<80x120xf32>, vector<1x120xf32> -> vector<1x120xf32>
    %145 = arith.addf %140, %144 : vector<1x120xf32>
    %c0_118 = arith.constant 0 : index
    %c0_119 = arith.constant 0 : index
    %146 = vector.load %arg9[%c0_118, %c0_119] : memref<1x120xf32, #tpu.memory_space<vmem>>, vector<1x120xf32>
    %147 = arith.addf %145, %146 : vector<1x120xf32>
    %cst_120 = arith.constant 0.000000e+00 : f32
    %148 = vector.broadcast %cst_120 : f32 to vector<1x120xf32>
    %149 = arith.maximumf %147, %148 : vector<1x120xf32>
    %c0_121 = arith.constant 0 : index
    %c0_122 = arith.constant 0 : index
    %150 = vector.load %arg10[%c0_121, %c0_122] : memref<120x84xf32, #tpu.memory_space<vmem>>, vector<120x84xf32>
    %cst_123 = arith.constant dense<0.000000e+00> : vector<1x84xf32>
    %151 = tpu.matmul %149, %150, %cst_123 {dimension_numbers = #tpu.dot_dimension_numbers<[1], [0], [0], [1], [0, 0, 1, 1], [], []>} : vector<1x120xf32>, vector<120x84xf32>, vector<1x84xf32> -> vector<1x84xf32>
    %c0_124 = arith.constant 0 : index
    %c0_125 = arith.constant 0 : index
    %152 = vector.load %arg11[%c0_124, %c0_125] : memref<1x84xf32, #tpu.memory_space<vmem>>, vector<1x84xf32>
    %153 = arith.addf %151, %152 : vector<1x84xf32>
    %cst_126 = arith.constant 0.000000e+00 : f32
    %154 = vector.broadcast %cst_126 : f32 to vector<1x84xf32>
    %155 = arith.maximumf %153, %154 : vector<1x84xf32>
    %c0_127 = arith.constant 0 : index
    %c0_128 = arith.constant 0 : index
    %156 = vector.load %arg12[%c0_127, %c0_128] : memref<84x10xf32, #tpu.memory_space<vmem>>, vector<84x10xf32>
    %cst_129 = arith.constant dense<0.000000e+00> : vector<1x10xf32>
    %157 = tpu.matmul %155, %156, %cst_129 {dimension_numbers = #tpu.dot_dimension_numbers<[1], [0], [0], [1], [0, 0, 1, 1], [], []>} : vector<1x84xf32>, vector<84x10xf32>, vector<1x10xf32> -> vector<1x10xf32>
    %c0_130 = arith.constant 0 : index
    %c0_131 = arith.constant 0 : index
    %158 = vector.load %arg13[%c0_130, %c0_131] : memref<1x10xf32, #tpu.memory_space<vmem>>, vector<1x10xf32>
    %159 = arith.addf %157, %158 : vector<1x10xf32>
    %c0_132 = arith.constant 0 : index
    %c0_133 = arith.constant 0 : index
    %c0_134 = arith.constant 0 : index
    %160 = vector.load %arg14[%c0_132, %c0_133, %c0_134] : memref<1x1x10xf32, #tpu.memory_space<vmem>>, vector<1x1x10xf32>
    %161 = vector.shape_cast %160 : vector<1x1x10xf32> to vector<1x10xf32>
    %162 = vector.shape_cast %159 : vector<1x10xf32> to vector<1x1x10xf32>
    tpu.vector_store %arg14[%c0_132, %c0_133, %c0_134], %162 {strides = array<i32>} : memref<1x1x10xf32, #tpu.memory_space<vmem>>, vector<1x1x10xf32>,
    return
  }
  func.func @transform_0(%arg0: i32) -> (i32, i32, i32) {
    %c0_i32 = arith.constant 0 : i32
    %c0_i32_0 = arith.constant 0 : i32
    %c0_i32_1 = arith.constant 0 : i32
    return %arg0, %c0_i32, %c0_i32_0 : i32, i32, i32
  }
  func.func @transform_1(%arg0: i32) -> (i32, i32, i32) {
    %c0_i32 = arith.constant 0 : i32
    %c0_i32_0 = arith.constant 0 : i32
    %c0_i32_1 = arith.constant 0 : i32
    %c0_i32_2 = arith.constant 0 : i32
    return %c0_i32, %c0_i32_0, %c0_i32_1 : i32, i32, i32
  }
  func.func @transform_2(%arg0: i32) -> (i32, i32, i32) {
    %c0_i32 = arith.constant 0 : i32
    %c0_i32_0 = arith.constant 0 : i32
    %c0_i32_1 = arith.constant 0 : i32
    %c0_i32_2 = arith.constant 0 : i32
    return %c0_i32, %c0_i32_0, %c0_i32_1 : i32, i32, i32
  }
  func.func @transform_3(%arg0: i32) -> (i32, i32, i32) {
    %c0_i32 = arith.constant 0 : i32
    %c0_i32_0 = arith.constant 0 : i32
    %c0_i32_1 = arith.constant 0 : i32
    %c0_i32_2 = arith.constant 0 : i32
    return %c0_i32, %c0_i32_0, %c0_i32_1 : i32, i32, i32
  }
  func.func @transform_4(%arg0: i32) -> (i32, i32, i32) {
    %c0_i32 = arith.constant 0 : i32
    %c0_i32_0 = arith.constant 0 : i32
    %c0_i32_1 = arith.constant 0 : i32
    %c0_i32_2 = arith.constant 0 : i32
    return %c0_i32, %c0_i32_0, %c0_i32_1 : i32, i32, i32
  }
  func.func @transform_5(%arg0: i32) -> (i32, i32) {
    %c0_i32 = arith.constant 0 : i32
    %c0_i32_0 = arith.constant 0 : i32
    %c0_i32_1 = arith.constant 0 : i32
    return %c0_i32, %c0_i32_0 : i32, i32
  }
  func.func @transform_6(%arg0: i32) -> (i32, i32) {
    %c0_i32 = arith.constant 0 : i32
    %c0_i32_0 = arith.constant 0 : i32
    %c0_i32_1 = arith.constant 0 : i32
    return %c0_i32, %c0_i32_0 : i32, i32
  }
  func.func @transform_7(%arg0: i32) -> (i32, i32, i32) {
    %c0_i32 = arith.constant 0 : i32
    %c0_i32_0 = arith.constant 0 : i32
    %c0_i32_1 = arith.constant 0 : i32
    %c0_i32_2 = arith.constant 0 : i32
    return %c0_i32, %c0_i32_0, %c0_i32_1 : i32, i32, i32
  }
  func.func @transform_8(%arg0: i32) -> (i32, i32) {
    %c0_i32 = arith.constant 0 : i32
    %c0_i32_0 = arith.constant 0 : i32
    %c0_i32_1 = arith.constant 0 : i32
    return %c0_i32, %c0_i32_0 : i32, i32
  }
  func.func @transform_9(%arg0: i32) -> (i32, i32) {
    %c0_i32 = arith.constant 0 : i32
    %c0_i32_0 = arith.constant 0 : i32
    %c0_i32_1 = arith.constant 0 : i32
    return %c0_i32, %c0_i32_0 : i32, i32
  }
  func.func @transform_10(%arg0: i32) -> (i32, i32) {
    %c0_i32 = arith.constant 0 : i32
    %c0_i32_0 = arith.constant 0 : i32
    %c0_i32_1 = arith.constant 0 : i32
    return %c0_i32, %c0_i32_0 : i32, i32
  }
  func.func @transform_11(%arg0: i32) -> (i32, i32) {
    %c0_i32 = arith.constant 0 : i32
    %c0_i32_0 = arith.constant 0 : i32
    %c0_i32_1 = arith.constant 0 : i32
    return %c0_i32, %c0_i32_0 : i32, i32
  }
  func.func @transform_12(%arg0: i32) -> (i32, i32) {
    %c0_i32 = arith.constant 0 : i32
    %c0_i32_0 = arith.constant 0 : i32
    %c0_i32_1 = arith.constant 0 : i32
    return %c0_i32, %c0_i32_0 : i32, i32
  }
  func.func @transform_13(%arg0: i32) -> (i32, i32, i32) {
    %c0_i32 = arith.constant 0 : i32
    %c0_i32_0 = arith.constant 0 : i32
    %c0_i32_1 = arith.constant 0 : i32
    return %arg0, %c0_i32, %c0_i32_0 : i32, i32, i32
  }
}

</mosaic_0001>

<bundles_post_ra>
// kernel: model_forward.1
= control target key start
LH: loop header
LB: loop body
LE: loop exit
PB: predicated region body
PF: predicated region fallthrough
CT: control target
= control target key end

     0   :  { %18 = vsyncpa [#allocation3], 0  ;;  %s3588_s0 = inlined_call_operand.vmem [shape: f32[2,32,96], index: 0, kind: input, shape index: {}]   ;;  %s3589_s1 = inlined_call_operand.vmem [shape: f32[10,96,84], index: 1, kind: input, shape index: {}]   ;;  %s3590_s2 = inlined_call_operand.vmem [shape: f32[10,84,80], index: 2, kind: input, shape index: {}]   ;;  %s3591_s3 = inlined_call_operand.vmem [shape: f32[2,14,28], index: 3, kind: input, shape index: {}]   ;;  %s3592_s4 = inlined_call_operand.vmem [shape: f32[2,5,10], index: 4, kind: input, shape index: {}]   ;;  %s3593_s5 = inlined_call_operand.vmem [shape: f32[1,84], index: 5, kind: input, shape index: {}]   ;;  %s3594_s6 = inlined_call_operand.vmem [shape: f32[1,80], index: 6, kind: input, shape index: {}]   ;;  %s3595_s7 = inlined_call_operand.vmem [shape: f32[5,80,120], index: 7, kind: input, shape index: {}]   ;;  %s3596_s8 = inlined_call_operand.vmem [shape: f32[1,120], index: 8, kind: input, shape index: {}]   ;;  %s3597_s9 = inlined_call_operand.vmem [shape: f32[120,84], index: 9, kind: input, shape index: {}]   ;;  %s3598_s10 = inlined_call_operand.vmem [shape: f32[1,84], index: 10, kind: input, shape index: {}]   ;;  %s3599_s11 = inlined_call_operand.vmem [shape: f32[84,10], index: 11, kind: input, shape index: {}]   ;;  %s3600_s12 = inlined_call_operand.vmem [shape: f32[1,10], index: 12, kind: input, shape index: {}]   ;;  %s3601_s13 = inlined_call_operand.hbm [shape: f32[2,1,10], index: 13, kind: output, shape index: {}]  }
   0x1   :  { %20 = vsyncpa [#allocation3 + $0x1], 0  ;;  %s2391_s25 = smov 0   ;;  %s2393_s26 = smov 0  }
   0x2   :  { %s2395_s27 = smov 0   ;;  %s2397_s28 = smov 0  }
   0x3 LB: > { %3606 = sst [smem:[#allocation5_spill]] %s2315_s27  ;;  %s2412_s29 = sadd.s32 4294967295, %s2319_s28   ;;  %s2319_s28 = sphi %s2397_s28, %s3613_s28   ;;  %s2315_s27 = sphi %s2395_s27, %s3615_s27   ;;  %s2311_s26 = sphi %s2393_s26, %s3617_s26   ;;  %s2307_s25 = sphi %s2391_s25, %s3616_s25  }
   0x4   : > { %s1857_s30 = sadd.s32 4294967294, %s2319_s28   ;;  %s2416_s14 = sadd.s32 1, %s2319_s28  }
   0x5   : > { %3607 = sst [smem:[#allocation6_spill]] %s2416_s14  ;;  %s311_s15 = sadd.s32 1, %s2315_s27 }
   0x6   : > { %s308_s16 = ssub.s32 %s2319_s28, %s2416_s14  ;;  %p321_p0 = scmp.ne.s32.totalorder %s2315_s27, %s2311_s26 }
   0x7   : > { %p309_p1 = scmp.eq.s32.totalorder %s308_s16, 0  ;;  %p322_p2 = scmp.eq.s32.totalorder %s2412_s29, 1 }
   0x8   : > { %p327_p3 = scmp.ne.s32.totalorder %s2311_s26, %s2307_s25  ;;  %p328_p4 = scmp.eq.s32.totalorder %s1857_s30, 1 }
   0x9   : > { %s2427_s17 = scalar_select %p309_p1, %s2315_s27, %s311_s15  }
   0xa   : > { %p2429_p5 = por %p322_p2, %p321_p0  ;;  %p2433_p6 = por %p328_p4, %p327_p3 }
   0xb   : > { %3608 = sst [smem:[#allocation7_spill]] %s2427_s17  ;;  %p1860_p7 = scmp.ge.s32.totalorder %s2319_s28, 1 }
   0xc   : > { %s3610_s19 = scalar_select %p2433_p6, 1, 0 }
   0xd   : > { %p390_p8 = scmp.lt.s32.totalorder %s2319_s28, 3 }
   0xe   : > { %3611 = sst [smem:[#allocation8_spill]] %s3610_s19 }
   0xf   : > { %p391_p9 = pnand %p1860_p7, %p390_p8 }
  0x10   : > { %p433_p10 = scmp.lt.s32.totalorder (!%p391_p9), %s2412_s29, 1  ;;  %s431_s14 = sand.u32 (!%p391_p9), 1, %s2311_s26  }
  0x11   : > { %394 = sbr.rel (%p391_p9) target bundleno = 1148 (0x47c), region = 72  ;;  %s1798_s27 = scalar_lea.hbm (!%p391_p9), %s3601_s13, %s2412_s29 }
  0x12   : > { %s432_s21 = scalar_lea.vmem (!%p391_p9), [#allocation2], %s431_s14  ;;  %s1802_s22 = sshll.u32 (!%p391_p9), %s1798_s27, 4  ;;  %s1803_s22 = int_to_ptr.hbm [resolvable:$true] %s1802_s22 }
  0x13   : > { %s2277_s16 = scalar_lea.hbm (!%p391_p9), %s3601_s13, 2 }
  0x16   : > { %v1886_v0 = vld [vmem:[%s3589_s1 + $0x118] sm:$0xff]  ;;  %v1885_v4 = vld [vmem:[%s3589_s1 + $0x110] sm:$0xff]  ;;  %v1884_v8 = vld [vmem:[%s3589_s1 + $0x108] sm:$0xff]  ;;  %s2497_s15 = scalar_select %p433_p10, %s2412_s29, 1  ;;  %vm484_vm0 = vcmask 1046528   ;;  %vm492_vm1 = vcmask 785408  }
  0x17   : > { %v453_v1 = vld [vmem:[%s3589_s1 + $0x58] sm:$0xff]  ;;  %505 = vmatpush.msra.mxu0 %v1886_v0  ;;  %v452_v5 = vld [vmem:[%s3589_s1 + $0x50] sm:$0xff]  ;;  %v451_v9 = vld [vmem:[%s3589_s1 + $0x48] sm:$0xff]  ;;  %vm651_vm2 = vcmask 1045504   ;;  %vm759_vm3 = vcmask 1044480   ;;  %vm867_vm4 = vcmask 1043456  }
  0x18   : > { %v1906_v2 = vld [vmem:[%s3589_s1 + $0x178] sm:$0xff]  ;;  %542 = vmatpush.msra.mxu1 %v453_v1  ;;  %v1905_v6 = vld [vmem:[%s3589_s1 + $0x170] sm:$0xff]  ;;  %v1904_v10 = vld [vmem:[%s3589_s1 + $0x168] sm:$0xff]  ;;  %s2203_s23 = sshll.u32 %s2497_s15, 5  ;;  %vm968_vm5 = vcmask 228352   ;;  %vm1083_vm6 = vcmask 687104  }
  0x19   : > { %v1874_v3 = vld [vmem:[%s3589_s1 + $0xb8] sm:$0xff]  ;;  %584 = vmatpush.msra.mxu2 %v1906_v2  ;;  %v1873_v7 = vld [vmem:[%s3589_s1 + $0xb0] sm:$0xff]  ;;  %506 = vmatpush.msra.mxu0 %v1885_v4  ;;  %v1872_v11 = vld [vmem:[%s3589_s1 + $0xa8] sm:$0xff]  ;;  %s2545_s19 = scalar_lea.vmem %s3588_s0, %s2203_s23  ;;  %vm1476_vm7 = vcmask 1041408   ;;  %vm1472_vm8 = vcmask 80896   ;;  %vm1555_vm9 = vcmask 654336  }
  0x1a   : > { %613 = vmatpush.msra.mxu3 %v1874_v3  ;;  %543 = vmatpush.msra.mxu1 %v452_v5  ;;  %v1883_v12 = vld [vmem:[%s3589_s1 + $0x100] sm:$0xff]  ;;  %v1882_v16 = vld [vmem:[%s3589_s1 + $0xf8] sm:$0xff]  ;;  %v1881_v20 = vld [vmem:[%s3589_s1 + $0xf0] sm:$0xff]  ;;  %vm1724_vm10 = vcmask 982016   ;;  %s1800_s15 = sshll.u32 %s432_s21, 4  ;;  %vm1787_vm11 = vcmask 73728   ;;  %s1801_s15 = int_to_ptr.vmem [resolvable:$true] %s1800_s15 }
  0x1b   : > { %585 = vmatpush.msra.mxu2 %v1905_v6  ;;  %v450_v13 = vld [vmem:[%s3589_s1 + $0x40] sm:$0xff]  ;;  %507 = vmatpush.msra.mxu0 %v1884_v8  ;;  %v449_v17 = vld [vmem:[%s3589_s1 + $0x38] sm:$0xff]  ;;  %v448_v21 = vld [vmem:[%s3589_s1 + $0x30] sm:$0xff]  ;;  %s1790_s23 = scalar_lea.sflag [#allocation3], %s431_s14 }
  0x1c   : > { %614 = vmatpush.msra.mxu3 %v1873_v7  ;;  %544 = vmatpush.msra.mxu1 %v451_v9  ;;  %v1903_v14 = vld [vmem:[%s3589_s1 + $0x160] sm:$0xff]  ;;  %v1902_v18 = vld [vmem:[%s3589_s1 + $0x158] sm:$0xff]  ;;  %v1901_v22 = vld [vmem:[%s3589_s1 + $0x150] sm:$0xff] }
  0x1d   : > { %v1871_v15 = vld [vmem:[%s3589_s1 + $0xa0] sm:$0xff]  ;;  %586 = vmatpush.msra.mxu2 %v1904_v10  ;;  %508 = vmatpush.msra.mxu0 %v1883_v12  ;;  %v1870_v19 = vld [vmem:[%s3589_s1 + $0x98] sm:$0xff]  ;;  %v1869_v23 = vld [vmem:[%s3589_s1 + $0x90] sm:$0xff] }
  0x1e   : > { %615 = vmatpush.msra.mxu3 %v1872_v11  ;;  %545 = vmatpush.msra.mxu1 %v450_v13  ;;  %v1880_v24 = vld [vmem:[%s3589_s1 + $0xe8] sm:$0xff]  ;;  %v1879_v28 = vld [vmem:[%s3589_s1 + $0xe0] sm:$0xff]  ;;  %v1878_v32 = vld [vmem:[%s3589_s1 + $0xd8] sm:$0xff] }
  0x1f   : > { %587 = vmatpush.msra.mxu2 %v1903_v14  ;;  %509 = vmatpush.msra.mxu0 %v1882_v16  ;;  %v447_v25 = vld [vmem:[%s3589_s1 + $0x28] sm:$0xff]  ;;  %v446_v29 = vld [vmem:[%s3589_s1 + $0x20] sm:$0xff]  ;;  %v445_v33 = vld [vmem:[%s3589_s1 + $0x18] sm:$0xff] }
  0x20   : > { %616 = vmatpush.msra.mxu3 %v1871_v15  ;;  %546 = vmatpush.msra.mxu1 %v449_v17  ;;  %v1900_v26 = vld [vmem:[%s3589_s1 + $0x148] sm:$0xff]  ;;  %v1899_v30 = vld [vmem:[%s3589_s1 + $0x140] sm:$0xff]  ;;  %v1898_v34 = vld [vmem:[%s3589_s1 + $0x138] sm:$0xff] }
  0x21   : > { %588 = vmatpush.msra.mxu2 %v1902_v18  ;;  %510 = vmatpush.msra.mxu0 %v1881_v20  ;;  %v1868_v27 = vld [vmem:[%s3589_s1 + $0x88] sm:$0xff]  ;;  %v1867_v31 = vld [vmem:[%s3589_s1 + $0x80] sm:$0xff]  ;;  %v1866_v35 = vld [vmem:[%s3589_s1 + $0x78] sm:$0xff] }
  0x22   : > { %617 = vmatpush.msra.mxu3 %v1870_v19  ;;  %547 = vmatpush.msra.mxu1 %v448_v21  ;;  %v1877_v36 = vld [vmem:[%s3589_s1 + $0xd0] sm:$0xff]  ;;  %v2566_v38 = vld [vmem:[%s2545_s19] sm:$0xff]  ;;  %v2569_v39 = vld [vmem:[%s2545_s19 + $0x8] sm:$0xff] }
  0x23   : > { %589 = vmatpush.msra.mxu2 %v1901_v22  ;;  %511 = vmatpush.msra.mxu0 %v1880_v24  ;;  %v444_v37 = vld [vmem:[%s3589_s1 + $0x10] sm:$0xff]  ;;  %v1876_v42 = vld [vmem:[%s3589_s1 + $0xc8] sm:$0xff]  ;;  %v485_v44 = vrot.slane %v2566_v38, 1  ;;  %v486_v45 = vrot.slane %v2569_v39, 1  ;;  %v1875_v48 = vld [vmem:[%s3589_s1 + $0xc0] sm:$0xff] }
  0x24   : > { %618 = vmatpush.msra.mxu3 %v1869_v23  ;;  %548 = vmatpush.msra.mxu1 %v447_v25  ;;  %v1897_v40 = vld [vmem:[%s3589_s1 + $0x130] sm:$0xff]  ;;  %v443_v43 = vld [vmem:[%s3589_s1 + $0x8] sm:$0xff]  ;;  %v442_v49 = vld [vmem:[%s3589_s1] sm:$0xff] }
  0x25   : > { %590 = vmatpush.msra.mxu2 %v1900_v26  ;;  %512 = vmatpush.msra.mxu0 %v1879_v28  ;;  %v1865_v41 = vld [vmem:[%s3589_s1 + $0x70] sm:$0xff]  ;;  %v1896_v46 = vld [vmem:[%s3589_s1 + $0x128] sm:$0xff]  ;;  %v1895_v50 = vld [vmem:[%s3589_s1 + $0x120] sm:$0xff]  ;;  %v487_v52 = vsel %vm484_vm0, %v485_v44, %v486_v45  ;;  %v761_v44 = vrot.slane %v2569_v39, 3 }
  0x26   : > { %619 = vmatpush.msra.mxu3 %v1868_v27  ;;  %549 = vmatpush.msra.mxu1 %v446_v29  ;;  %v1864_v47 = vld [vmem:[%s3589_s1 + $0x68] sm:$0xff]  ;;  %v1863_v51 = vld [vmem:[%s3589_s1 + $0x60] sm:$0xff]  ;;  %v2605_v53 = vld [vmem:[%s2545_s19 + $0x10] sm:$0xff] }
  0x27   : > { %591 = vmatpush.msra.mxu2 %v1899_v30  ;;  %513 = vmatpush.msra.mxu0 %v1878_v32  ;;  %v1926_v54 = vld [vmem:[%s3589_s1 + $0x1d8] sm:$0xff]  ;;  %v488_v58 = vrot.slane %v2605_v53, 1  ;;  %v1925_v59 = vld [vmem:[%s3589_s1 + $0x1d0] sm:$0xff]  ;;  %v1924_v63 = vld [vmem:[%s3589_s1 + $0x1c8] sm:$0xff] }
  0x28   : > { %620 = vmatpush.msra.mxu3 %v1867_v31  ;;  %550 = vmatpush.msra.mxu1 %v445_v33  ;;  %v1942_v55 = vld [vmem:[%s3589_s1 + $0x238] sm:$0xff]  ;;  %v1941_v60 = vld [vmem:[%s3589_s1 + $0x230] sm:$0xff]  ;;  %v1940_v0 = vld [vmem:[%s3589_s1 + $0x228] sm:$0xff] }
  0x29   : > { %592 = vmatpush.msra.mxu2 %v1898_v34  ;;  %514 = vmatpush.msra.mxu0 %v1877_v36  ;;  %v1958_v56 = vld [vmem:[%s3589_s1 + $0x298] sm:$0xff]  ;;  %v1957_v61 = vld [vmem:[%s3589_s1 + $0x290] sm:$0xff]  ;;  %v1956_v1 = vld [vmem:[%s3589_s1 + $0x288] sm:$0xff]  ;;  %v489_v3 = vsel %vm484_vm0, %v486_v45, %v488_v58 }
  0x2a   : > { %621 = vmatpush.msra.mxu3 %v1866_v35  ;;  %551 = vmatpush.msra.mxu1 %v444_v37  ;;  %v1974_v57 = vld [vmem:[%s3589_s1 + $0x2f8] sm:$0xff]  ;;  %v1973_v62 = vld [vmem:[%s3589_s1 + $0x2f0] sm:$0xff]  ;;  %v1972_v2 = vld [vmem:[%s3589_s1 + $0x2e8] sm:$0xff]  ;;  %v652_v37 = vrot.slane %v2566_v38, 2 }
  0x2b   : > { %593 = vmatpush.msra.mxu2 %v1897_v40  ;;  %515 = vmatpush.msra.mxu0 %v1876_v42  ;;  %v2652_v4 = vld [vmem:[%s2545_s19 + $0x18] sm:$0xff]  ;;  %v1923_v5 = vld [vmem:[%s3589_s1 + $0x1c0] sm:$0xff]  ;;  %v1921_v14 = vld [vmem:[%s3589_s1 + $0x1b0] sm:$0xff]  ;;  %v653_v40 = vrot.slane %v2569_v39, 2  ;;  %s2271_s19 = sshra.s32 %s1803_s22, 4  ;;  %s2272_s19 = int_to_ptr.hbm [resolvable:$true] %s2271_s19 }
  0x2c   : > { %622 = vmatpush.msra.mxu3 %v1865_v41  ;;  %552 = vmatpush.msra.mxu1 %v443_v43  ;;  %v1939_v6 = vld [vmem:[%s3589_s1 + $0x220] sm:$0xff]  ;;  %v490_v9 = vrot.slane %v2652_v4, 1  ;;  %v1922_v10 = vld [vmem:[%s3589_s1 + $0x1b8] sm:$0xff]  ;;  %v1937_v15 = vld [vmem:[%s3589_s1 + $0x210] sm:$0xff]  ;;  %v760_v43 = vrot.slane %v2566_v38, 3  ;;  %s2273_s24 = scalar_lea.hbm %s2272_s19, 1  ;;  %p2278_p0 = scmp.lt.s32.totalorder %s2272_s19, %s3601_s13 }
  0x2d   : > { %594 = vmatpush.msra.mxu2 %v1896_v46  ;;  %516 = vmatpush.msra.mxu0 %v1875_v48  ;;  %v1955_v7 = vld [vmem:[%s3589_s1 + $0x280] sm:$0xff]  ;;  %v1938_v11 = vld [vmem:[%s3589_s1 + $0x218] sm:$0xff]  ;;  %v1953_v16 = vld [vmem:[%s3589_s1 + $0x270] sm:$0xff]  ;;  %p2274_p11 = scmp.ne.s32.totalorder %s2272_s19, %s2273_s24  ;;  %p2279_p1 = scmp.lt.s32.totalorder %s2277_s16, %s2273_s24 }
  0x2e   : > { %623 = vmatpush.msra.mxu3 %v1864_v47  ;;  %553 = vmatpush.msra.mxu1 %v442_v49  ;;  %v1971_v8 = vld [vmem:[%s3589_s1 + $0x2e0] sm:$0xff]  ;;  %v1954_v12 = vld [vmem:[%s3589_s1 + $0x278] sm:$0xff]  ;;  %v1969_v17 = vld [vmem:[%s3589_s1 + $0x2d0] sm:$0xff]  ;;  %v491_v18 = vsel %vm484_vm0, %v488_v58, %v490_v9  ;;  %v654_v49 = vsel %vm651_vm2, %v652_v37, %v653_v40  ;;  %v763_v58 = vrot.slane %v2605_v53, 3 }
  0x2f   : > { %595 = vmatpush.msra.mxu2 %v1895_v50  ;;  %1887 = vmatmul.msk.f32.vlgmr.msra.gmra.mxu0 %vm492_vm1, %v487_v52  ;;  %v1970_v13 = vld [vmem:[%s3589_s1 + $0x2d8] sm:$0xff]  ;;  %v1920_v19 = vld [vmem:[%s3589_s1 + $0x1a8] sm:$0xff]  ;;  %v1919_v23 = vld [vmem:[%s3589_s1 + $0x1a0] sm:$0xff]  ;;  %v762_v50 = vsel %vm759_vm3, %v760_v43, %v761_v44  ;;  %p2275_p12 = pnand %p2274_p11, %p2429_p5  ;;  %p2280_p2 = por %p2279_p1, %p2278_p0 }
  0x30   : > { %624 = vmatpush.msra.mxu3 %v1863_v51  ;;  %1891 = vmatmul.msk.f32.vlgmr.msra.gmra.mxu1 %vm492_vm1, %v2566_v38  ;;  %v1936_v20 = vld [vmem:[%s3589_s1 + $0x208] sm:$0xff]  ;;  %v1935_v24 = vld [vmem:[%s3589_s1 + $0x200] sm:$0xff]  ;;  %v1918_v27 = vld [vmem:[%s3589_s1 + $0x198] sm:$0xff]  ;;  %v868_v51 = vrot.slane %v2566_v38, 4 }
  0x31   : > { %1907 = vmatmul.msk.f32.vlgmr.msra.gmra.mxu2 %vm492_vm1, %v487_v52  ;;  %1911 = vmatmul.msk.f32.vlgmr.msra.gmra.mxu3 %vm492_vm1, %v2566_v38  ;;  %v1952_v21 = vld [vmem:[%s3589_s1 + $0x268] sm:$0xff]  ;;  %v1951_v25 = vld [vmem:[%s3589_s1 + $0x260] sm:$0xff]  ;;  %v1934_v28 = vld [vmem:[%s3589_s1 + $0x1f8] sm:$0xff]  ;;  %v869_v52 = vrot.slane %v2569_v39, 4  ;;  %v655_v38 = vrot.slane %v2605_v53, 2  ;;  %p2276_p13 = pneg %p2275_p12 }
  0x32   : > { %671 = vmatpush.msrb.mxu0 %v1926_v54  ;;  %717 = vmatpush.msrb.mxu1 %v1942_v55  ;;  %v1968_v22 = vld [vmem:[%s3589_s1 + $0x2c8] sm:$0xff]  ;;  %v1967_v26 = vld [vmem:[%s3589_s1 + $0x2c0] sm:$0xff]  ;;  %v1950_v29 = vld [vmem:[%s3589_s1 + $0x258] sm:$0xff] }
  0x33   : > { %779 = vmatpush.msrb.mxu2 %v1958_v56  ;;  %825 = vmatpush.msrb.mxu3 %v1974_v57  ;;  %v1966_v30 = vld [vmem:[%s3589_s1 + $0x2b8] sm:$0xff]  ;;  %v1917_v31 = vld [vmem:[%s3589_s1 + $0x190] sm:$0xff]  ;;  %v1916_v35 = vld [vmem:[%s3589_s1 + $0x188] sm:$0xff]  ;;  %v2799_v56 = vsel %vm867_vm4, %v868_v51, %v869_v52  ;;  %v871_v57 = vrot.slane %v2605_v53, 4  ;;  %p2281_p3 = pnand %p2280_p2, %p2276_p13 }
  0x34   : > { %672 = vmatpush.msrb.mxu0 %v1925_v59  ;;  %718 = vmatpush.msrb.mxu1 %v1941_v60  ;;  %v1933_v32 = vld [vmem:[%s3589_s1 + $0x1f0] sm:$0xff]  ;;  %v1932_v36 = vld [vmem:[%s3589_s1 + $0x1e8] sm:$0xff]  ;;  %v1915_v45 = vld [vmem:[%s3589_s1 + $0x180] sm:$0xff] }
  0x35   : > { %780 = vmatpush.msrb.mxu2 %v1957_v61  ;;  %826 = vmatpush.msrb.mxu3 %v1973_v62  ;;  %v1949_v33 = vld [vmem:[%s3589_s1 + $0x250] sm:$0xff]  ;;  %v1948_v41 = vld [vmem:[%s3589_s1 + $0x248] sm:$0xff]  ;;  %v1931_v46 = vld [vmem:[%s3589_s1 + $0x1e0] sm:$0xff]  ;;  %v2818_v61 = vsel %vm867_vm4, %v869_v52, %v871_v57 }
  0x36   : > { %673 = vmatpush.msrb.mxu0 %v1924_v63  ;;  %719 = vmatpush.msrb.mxu1 %v1940_v0  ;;  %v1965_v34 = vld [vmem:[%s3589_s1 + $0x2b0] sm:$0xff]  ;;  %v1964_v42 = vld [vmem:[%s3589_s1 + $0x2a8] sm:$0xff]  ;;  %v1947_v47 = vld [vmem:[%s3589_s1 + $0x240] sm:$0xff]  ;;  %v656_v63 = vsel %vm651_vm2, %v653_v40, %v655_v38  ;;  %v764_v0 = vsel %vm759_vm3, %v761_v44, %v763_v58 }
  0x37   : > { %781 = vmatpush.msrb.mxu2 %v1956_v1  ;;  %827 = vmatpush.msrb.mxu3 %v1972_v2  ;;  %v1963_v48 = vld [vmem:[%s3589_s1 + $0x2a0] sm:$0xff]  ;;  %v1990_v54 = vld [vmem:[%s3589_s1 + $0x358] sm:$0xff]  ;;  %v2005_v59 = vld [vmem:[%s3589_s1 + $0x3b0] sm:$0xff] }
  0x38   : > { %1888 = vmatmul.msk.f32.gmra.mxu0 %vm492_vm1, %v489_v3  ;;  %1892 = vmatmul.msk.f32.gmra.mxu1 %vm492_vm1, %v2569_v39  ;;  %v2006_v55 = vld [vmem:[%s3589_s1 + $0x3b8] sm:$0xff]  ;;  %v1988_v60 = vld [vmem:[%s3589_s1 + $0x348] sm:$0xff]  ;;  %v1987_v1 = vld [vmem:[%s3589_s1 + $0x340] sm:$0xff] }
  0x39   : > { %1908 = vmatmul.msk.f32.gmra.mxu2 %vm492_vm1, %v489_v3  ;;  %1912 = vmatmul.msk.f32.gmra.mxu3 %vm492_vm1, %v2569_v39  ;;  %v1989_v39 = vld [vmem:[%s3589_s1 + $0x350] sm:$0xff]  ;;  %v2004_v62 = vld [vmem:[%s3589_s1 + $0x3a8] sm:$0xff]  ;;  %v2003_v2 = vld [vmem:[%s3589_s1 + $0x3a0] sm:$0xff]  ;;  %v657_v3 = vrot.slane %v2652_v4, 2 }
  0x3a   : > { %674 = vmatpush.msrb.mxu0 %v1923_v5  ;;  %720 = vmatpush.msrb.mxu1 %v1939_v6  ;;  %v1986_v5 = vld [vmem:[%s3589_s1 + $0x338] sm:$0xff]  ;;  %v765_v6 = vrot.slane %v2652_v4, 3 }
  0x3b   : > { %782 = vmatpush.msrb.mxu2 %v1955_v7  ;;  %828 = vmatpush.msrb.mxu3 %v1971_v8  ;;  %v2002_v7 = vld [vmem:[%s3589_s1 + $0x398] sm:$0xff]  ;;  %v1985_v8 = vld [vmem:[%s3589_s1 + $0x330] sm:$0xff] }
  0x3c   : > { %675 = vmatpush.msrb.mxu0 %v1922_v10  ;;  %721 = vmatpush.msrb.mxu1 %v1938_v11  ;;  %v658_v10 = vsel %vm651_vm2, %v655_v38, %v657_v3  ;;  %v766_v11 = vsel %vm759_vm3, %v763_v58, %v765_v6 }
  0x3d   : > { %783 = vmatpush.msrb.mxu2 %v1954_v12  ;;  %829 = vmatpush.msrb.mxu3 %v1970_v13  ;;  %v1984_v12 = vld [vmem:[%s3589_s1 + $0x328] sm:$0xff] }
  0x3e   : > { %676 = vmatpush.msrb.mxu0 %v1921_v14  ;;  %722 = vmatpush.msrb.mxu1 %v1937_v15  ;;  %v2000_v13 = vld [vmem:[%s3589_s1 + $0x388] sm:$0xff]  ;;  %v1983_v14 = vld [vmem:[%s3589_s1 + $0x320] sm:$0xff] }
  0x3f   : > { %784 = vmatpush.msrb.mxu2 %v1953_v16  ;;  %830 = vmatpush.msrb.mxu3 %v1969_v17  ;;  %v1999_v15 = vld [vmem:[%s3589_s1 + $0x380] sm:$0xff]  ;;  %v1982_v16 = vld [vmem:[%s3589_s1 + $0x318] sm:$0xff] }
  0x40   : > { %1889 = vmatmul.msk.f32.gmra.mxu0 %vm492_vm1, %v491_v18  ;;  %1893 = vmatmul.msk.f32.gmra.mxu1 %vm492_vm1, %v2605_v53  ;;  %v1998_v17 = vld [vmem:[%s3589_s1 + $0x378] sm:$0xff] }
  0x41   : > { %1909 = vmatmul.msk.f32.gmra.mxu2 %vm492_vm1, %v491_v18  ;;  %1913 = vmatmul.msk.f32.gmra.mxu3 %vm492_vm1, %v2605_v53  ;;  %v1981_v18 = vld [vmem:[%s3589_s1 + $0x310] sm:$0xff] }
  0x42   : > { %677 = vmatpush.msrb.mxu0 %v1920_v19  ;;  %723 = vmatpush.msrb.mxu1 %v1936_v20  ;;  %v1997_v19 = vld [vmem:[%s3589_s1 + $0x370] sm:$0xff]  ;;  %v1980_v20 = vld [vmem:[%s3589_s1 + $0x308] sm:$0xff] }
  0x43   : > { %785 = vmatpush.msrb.mxu2 %v1952_v21  ;;  %831 = vmatpush.msrb.mxu3 %v1968_v22  ;;  %v1996_v21 = vld [vmem:[%s3589_s1 + $0x368] sm:$0xff]  ;;  %v1979_v22 = vld [vmem:[%s3589_s1 + $0x300] sm:$0xff] }
  0x44   : > { %678 = vmatpush.msrb.mxu0 %v1919_v23  ;;  %724 = vmatpush.msrb.mxu1 %v1935_v24  ;;  %v1995_v23 = vld [vmem:[%s3589_s1 + $0x360] sm:$0xff]  ;;  %v873_v24 = vrot.slane %v2652_v4, 4 }
  0x45   : > { %786 = vmatpush.msrb.mxu2 %v1951_v25  ;;  %832 = vmatpush.msrb.mxu3 %v1967_v26 }
  0x46   : > { %679 = vmatpush.msrb.mxu0 %v1918_v27  ;;  %725 = vmatpush.msrb.mxu1 %v1934_v28 }
  0x47   : > { %787 = vmatpush.msrb.mxu2 %v1950_v29  ;;  %833 = vmatpush.msrb.mxu3 %v1966_v30 }
  0x48   : > { %1890 = vmatmul.msk.f32.gmra.mxu0 %vm492_vm1, %v490_v9  ;;  %1894 = vmatmul.msk.f32.gmra.mxu1 %vm492_vm1, %v2652_v4 }
  0x49   : > { %1910 = vmatmul.msk.f32.gmra.mxu2 %vm492_vm1, %v490_v9  ;;  %1914 = vmatmul.msk.f32.gmra.mxu3 %vm492_vm1, %v2652_v4  ;;  %v2001_v9 = vld [vmem:[%s3589_s1 + $0x390] sm:$0xff]  ;;  %v874_v4 = vsel %vm867_vm4, %v871_v57, %v873_v24 }
  0x4a   : > { %680 = vmatpush.msrb.mxu0 %v1917_v31  ;;  %726 = vmatpush.msrb.mxu1 %v1933_v32 }
  0x4b   : > { %788 = vmatpush.msrb.mxu2 %v1949_v33  ;;  %834 = vmatpush.msrb.mxu3 %v1965_v34 }
  0x4c   : > { %681 = vmatpush.msrb.mxu0 %v1916_v35  ;;  %727 = vmatpush.msrb.mxu1 %v1932_v36 }
  0x4d   : > { %789 = vmatpush.msrb.mxu2 %v1948_v41  ;;  %835 = vmatpush.msrb.mxu3 %v1964_v42 }
  0x4e   : > { %682 = vmatpush.msrb.mxu0 %v1915_v45  ;;  %728 = vmatpush.msrb.mxu1 %v1931_v46 }
  0x4f   : > { %790 = vmatpush.msrb.mxu2 %v1947_v47  ;;  %836 = vmatpush.msrb.mxu3 %v1963_v48 }
  0x50   : > { %1927 = vmatmul.msk.f32.vlgmr.msrb.gmra.mxu0 %vm492_vm1, %v654_v49  ;;  %1943 = vmatmul.msk.f32.vlgmr.msrb.gmra.mxu1 %vm492_vm1, %v654_v49 }
  0x51   : > { %1959 = vmatmul.msk.f32.vlgmr.msrb.gmra.mxu2 %vm492_vm1, %v762_v50  ;;  %1975 = vmatmul.msk.f32.vlgmr.msrb.gmra.mxu3 %vm492_vm1, %v762_v50 }
  0x52   : > { %887 = vmatpush.msra.mxu0 %v1990_v54  ;;  %2204 = vmatpush.msra.mxu3 %v1990_v54 }
  0x53   : > { %933 = vmatpush.msra.mxu1 %v2006_v55 }
  0x54   : > { %888 = vmatpush.msra.mxu0 %v1989_v39  ;;  %2205 = vmatpush.msra.mxu3 %v1989_v39 }
  0x55   : > { %934 = vmatpush.msra.mxu1 %v2005_v59 }
  0x56   : > { %889 = vmatpush.msra.mxu0 %v1988_v60  ;;  %2206 = vmatpush.msra.mxu3 %v1988_v60 }
  0x57   : > { %935 = vmatpush.msra.mxu1 %v2004_v62 }
  0x58   : > { %1928 = vmatmul.msk.f32.gmra.mxu0 %vm492_vm1, %v656_v63  ;;  %1944 = vmatmul.msk.f32.gmra.mxu1 %vm492_vm1, %v656_v63 }
  0x59   : > { %1960 = vmatmul.msk.f32.gmra.mxu2 %vm492_vm1, %v764_v0  ;;  %1976 = vmatmul.msk.f32.gmra.mxu3 %vm492_vm1, %v764_v0 }
  0x5a   : > { %890 = vmatpush.msra.mxu0 %v1987_v1  ;;  %2207 = vmatpush.msra.mxu3 %v1987_v1 }
  0x5b   : > { %936 = vmatpush.msra.mxu1 %v2003_v2 }
  0x5c   : > { %891 = vmatpush.msra.mxu0 %v1986_v5  ;;  %2208 = vmatpush.msra.mxu3 %v1986_v5 }
  0x5d   : > { %937 = vmatpush.msra.mxu1 %v2002_v7  ;;  %v2029_v7 = vld [vmem:[%s3590_s2 + $0xa8] sm:$0xf] }
  0x5e   : > { %892 = vmatpush.msra.mxu0 %v1985_v8  ;;  %2209 = vmatpush.msra.mxu3 %v1985_v8  ;;  %v2028_v8 = vld [vmem:[%s3590_s2 + $0xa0] sm:$0xff] }
  0x5f   : > { %938 = vmatpush.msra.mxu1 %v2001_v9  ;;  %v2027_v9 = vld [vmem:[%s3590_s2 + $0x98] sm:$0xff] }
  0x60   : > { %1929 = vmatmul.msk.f32.gmra.mxu0 %vm492_vm1, %v658_v10  ;;  %1945 = vmatmul.msk.f32.gmra.mxu1 %vm492_vm1, %v658_v10 }
  0x61   : > { %1961 = vmatmul.msk.f32.gmra.mxu2 %vm492_vm1, %v766_v11  ;;  %1977 = vmatmul.msk.f32.gmra.mxu3 %vm492_vm1, %v766_v11  ;;  %v2026_v11 = vld [vmem:[%s3590_s2 + $0x90] sm:$0xff] }
  0x62   : > { %893 = vmatpush.msra.mxu0 %v1984_v12  ;;  %2210 = vmatpush.msra.mxu3 %v1984_v12 }
  0x63   : > { %939 = vmatpush.msra.mxu1 %v2000_v13 }
  0x64   : > { %894 = vmatpush.msra.mxu0 %v1983_v14  ;;  %2211 = vmatpush.msra.mxu3 %v1983_v14 }
  0x65   : > { %940 = vmatpush.msra.mxu1 %v1999_v15 }
  0x66   : > { %895 = vmatpush.msra.mxu0 %v1982_v16  ;;  %2212 = vmatpush.msra.mxu3 %v1982_v16  ;;  %v2025_v16 = vld [vmem:[%s3590_s2 + $0x88] sm:$0xff] }
  0x67   : > { %941 = vmatpush.msra.mxu1 %v1998_v17 }
  0x68   : > { %1930 = vmatmul.msk.f32.gmra.mxu0 %vm492_vm1, %v657_v3  ;;  %1946 = vmatmul.msk.f32.gmra.mxu1 %vm492_vm1, %v657_v3 }
  0x69   : > { %1962 = vmatmul.msk.f32.gmra.mxu2 %vm492_vm1, %v765_v6  ;;  %1978 = vmatmul.msk.f32.gmra.mxu3 %vm492_vm1, %v765_v6 }
  0x6a   : > { %896 = vmatpush.msra.mxu0 %v1981_v18  ;;  %2213 = vmatpush.msra.mxu3 %v1981_v18 }
  0x6b   : > { %942 = vmatpush.msra.mxu1 %v1997_v19 }
  0x6c   : > { %897 = vmatpush.msra.mxu0 %v1980_v20  ;;  %2214 = vmatpush.msra.mxu3 %v1980_v20 }
  0x6d   : > { %943 = vmatpush.msra.mxu1 %v1996_v21 }
  0x6e   : > { %898 = vmatpush.msra.mxu0 %v1979_v22  ;;  %2215 = vmatpush.msra.mxu3 %v1979_v22 }
  0x6f   : > { %944 = vmatpush.msra.mxu1 %v1995_v23  ;;  %v2024_v23 = vld [vmem:[%s3590_s2 + $0x80] sm:$0xff] }
  0x70   : > { %1991 = vmatmul.msk.f32.vlgmr.msra.gmra.mxu0 %vm492_vm1, %v2799_v56  ;;  %2007 = vmatmul.msk.f32.vlgmr.msra.gmra.mxu1 %vm492_vm1, %v2799_v56 }
  0x71   : > { %1994 = vmatmul.msk.f32.vlgmr.msra.gmra.mxu3 %vm492_vm1, %v873_v24  ;;  %2061 = vmatpush.msk.msrb.mxu1 %vm867_vm4, %v2029_v7  ;;  %v1045_v7 = vld [vmem:[%s3590_s2 + $0x10] sm:$0xff] }
  0x73   : > { %1191 = vmatpush.msrb.mxu1 %v2028_v8  ;;  %v1044_v8 = vld [vmem:[%s3590_s2 + $0x8] sm:$0xff] }
  0x75   : > { %1192 = vmatpush.msrb.mxu1 %v2027_v9  ;;  %v1043_v9 = vld [vmem:[%s3590_s2] sm:$0xff] }
  0x77   : > { %1193 = vmatpush.msrb.mxu1 %v2026_v11  ;;  %v2087_v11 = vld [vmem:[%s3590_s2 + $0x200] sm:$0xff] }
  0x78   : > { %1992 = vmatmul.msk.f32.gmra.mxu0 %vm492_vm1, %v2818_v61  ;;  %2008 = vmatmul.msk.f32.gmra.mxu1 %vm492_vm1, %v2818_v61 }
  0x79   : > { %1194 = vmatpush.msrb.mxu1 %v2025_v16  ;;  %v2052_v16 = vld [vmem:[%s3590_s2 + $0x130] sm:$0xff] }
  0x7b   : > { %1195 = vmatpush.msrb.mxu1 %v2024_v23  ;;  %v2084_v23 = vld [vmem:[%s3590_s2 + $0x1e8] sm:$0xff] }
  0x80   : > { %1993 = vmatmul.msk.f32.gmra.mxu0 %vm492_vm1, %v874_v4  ;;  %2009 = vmatmul.msk.f32.gmra.mxu1 %vm492_vm1, %v874_v4 }
  0x88   : > { %2010 = vmatmul.msk.f32.gmra.mxu1 %vm492_vm1, %v873_v24  ;;  %v2057_v24 = vld [vmem:[%s3590_s2 + $0x158] sm:$0xf] }
  0x89   : > { %2058 = vmatpush.msk.msrb.mxu0 %vm867_vm4, %v2057_v24  ;;  %v2050_v24 = vld [vmem:[%s3590_s2 + $0x120] sm:$0xff] }
  0xac   : > { %v518_v25 = vpop.f32.mrf.mxu0 }
  0xad   : > { %v555_v26 = vpop.f32.mrf.mxu1 }
  0xae   : > { %v556_v27 = vadd.f32 %v555_v26, %v518_v25 }
  0xb4   : > { %v626_v28 = vpop.f32.mrf.mxu3  ;;  %v597_v32 = vpop.f32.mrf.mxu2 }
  0xb5   : > { %v521_v29 = vpop.f32.mrf.mxu0  ;;  %v558_v30 = vpop.f32.mrf.mxu1  ;;  %v627_v56 = vadd.f32 %v626_v28, %v597_v32 }
  0xb6   : > { %v559_v31 = vadd.f32 %v558_v30, %v521_v29 }
  0xbc   : > { %v629_v33 = vpop.f32.mrf.mxu3  ;;  %v600_v53 = vpop.f32.mrf.mxu2 }
  0xbd   : > { %v524_v34 = vpop.f32.mrf.mxu0  ;;  %v561_v35 = vpop.f32.mrf.mxu1  ;;  %v630_v17 = vadd.f32 %v629_v33, %v600_v53  ;;  %v2023_v33 = vld [vmem:[%s3590_s2 + $0x78] sm:$0xff] }
  0xbe   : > { %v562_v12 = vadd.f32 %v561_v35, %v524_v34  ;;  %v2056_v34 = vld [vmem:[%s3590_s2 + $0x150] sm:$0xff]  ;;  %1196 = vmatpush.msrb.mxu1 %v2023_v33  ;;  %v2073_v33 = vld [vmem:[%s3590_s2 + $0x1a8] sm:$0xff] }
  0xbf   : > { %1165 = vmatpush.msrb.mxu0 %v2056_v34  ;;  %v2112_v34 = vld [vmem:[%s3590_s2 + $0x298] sm:$0xff] }
  0xc4   : > { %v632_v40 = vpop.f32.mrf.mxu3  ;;  %v603_v43 = vpop.f32.mrf.mxu2 }
  0xc5   : > { %v527_v36 = vpop.f32.mrf.mxu0  ;;  %v564_v37 = vpop.f32.mrf.mxu1  ;;  %v633_v13 = vadd.f32 %v632_v40, %v603_v43  ;;  %v2055_v43 = vld [vmem:[%s3590_s2 + $0x148] sm:$0xff] }
  0xc6   : > { %v565_v14 = vadd.f32 %v564_v37, %v527_v36  ;;  %1166 = vmatpush.msrb.mxu0 %v2055_v43  ;;  %v2079_v43 = vld [vmem:[%s3590_s2 + $0x1c0] sm:$0xff] }
  0xcc   : > { %v635_v44 = vpop.f32.mrf.mxu3  ;;  %v606_v47 = vpop.f32.mrf.mxu2 }
  0xcd   : > { %v684_v41 = vpop.f32.mrf.mxu0  ;;  %v730_v42 = vpop.f32.mrf.mxu1  ;;  %v636_v15 = vadd.f32 %v635_v44, %v606_v47  ;;  %v2054_v44 = vld [vmem:[%s3590_s2 + $0x140] sm:$0xff] }
  0xce   : > { %v696_v38 = vadd.f32 %v684_v41, %v556_v27  ;;  %v742_v39 = vadd.f32 %v730_v42, %v627_v56  ;;  %v2022_v42 = vld [vmem:[%s3590_s2 + $0x70] sm:$0xff]  ;;  %1167 = vmatpush.msrb.mxu0 %v2054_v44  ;;  %v2040_v56 = vld [vmem:[%s3590_s2 + $0x100] sm:$0xf]  ;;  %v2101_v44 = vld [vmem:[%s3590_s2 + $0x258] sm:$0xff] }
  0xcf   : > { %1197 = vmatpush.msrb.mxu1 %v2022_v42  ;;  %v2110_v42 = vld [vmem:[%s3590_s2 + $0x288] sm:$0xff] }
  0xd4   : > { %v838_v48 = vpop.f32.mrf.mxu3  ;;  %v792_v51 = vpop.f32.mrf.mxu2 }
  0xd5   : > { %v687_v45 = vpop.f32.mrf.mxu0  ;;  %v733_v46 = vpop.f32.mrf.mxu1  ;;  %v804_v57 = vadd.f32 %v792_v51, %v696_v38  ;;  %v850_v58 = vadd.f32 %v838_v48, %v742_v39  ;;  %v2021_v48 = vld [vmem:[%s3590_s2 + $0x68] sm:$0xff]  ;;  %v2039_v39 = vld [vmem:[%s3590_s2 + $0xf8] sm:$0xff] }
  0xd6   : > { %v697_v4 = vadd.f32 %v687_v45, %v559_v31  ;;  %v743_v25 = vadd.f32 %v733_v46, %v630_v17  ;;  %1198 = vmatpush.msrb.mxu1 %v2021_v48  ;;  %v1052_v38 = vld [vmem:[%s3590_s2 + $0x48] sm:$0xff]  ;;  %v2116_v17 = vld [vmem:[%s3590_s2 + $0x2b8] sm:$0xf]  ;;  %v2100_v48 = vld [vmem:[%s3590_s2 + $0x250] sm:$0xff] }
  0xdc   : > { %v841_v52 = vpop.f32.mrf.mxu3  ;;  %v795_v59 = vpop.f32.mrf.mxu2 }
  0xdd   : > { %v690_v49 = vpop.f32.mrf.mxu0  ;;  %v736_v50 = vpop.f32.mrf.mxu1  ;;  %v805_v35 = vadd.f32 %v795_v59, %v697_v4  ;;  %v851_v31 = vadd.f32 %v841_v52, %v743_v25  ;;  %v966_v52 = vld [vmem:[%s3591_s3] sm:$0xff]  ;;  %v1050_v59 = vld [vmem:[%s3590_s2 + $0x38] sm:$0xff]  ;;  %v2114_v4 = vld [vmem:[%s3590_s2 + $0x2a8] sm:$0xff] }
  0xde   : > { %v698_v19 = vadd.f32 %v690_v49, %v562_v12  ;;  %v744_v20 = vadd.f32 %v736_v50, %v633_v13  ;;  %v2020_v50 = vld [vmem:[%s3590_s2 + $0x60] sm:$0xff]  ;;  %v2053_v12 = vld [vmem:[%s3590_s2 + $0x138] sm:$0xff]  ;;  %v2033_v13 = vld [vmem:[%s3590_s2 + $0xc8] sm:$0xff] }
  0xdf   : > { %1199 = vmatpush.msrb.mxu1 %v2020_v50  ;;  %1168 = vmatpush.msrb.mxu0 %v2053_v12  ;;  %v2030_v25 = vld [vmem:[%s3590_s2 + $0xb0] sm:$0xff]  ;;  %v2108_v50 = vld [vmem:[%s3590_s2 + $0x278] sm:$0xff] }
  0xe1   : > { %1169 = vmatpush.msrb.mxu0 %v2052_v16 }
  0xe4   : > { %v844_v0 = vpop.f32.mrf.mxu3  ;;  %v798_v3 = vpop.f32.mrf.mxu2 }
  0xe5   : > { %v693_v54 = vpop.f32.mrf.mxu0  ;;  %v739_v55 = vpop.f32.mrf.mxu1  ;;  %v806_v28 = vadd.f32 %v798_v3, %v698_v19  ;;  %v852_v29 = vadd.f32 %v844_v0, %v744_v20  ;;  %v2036_v0 = vld [vmem:[%s3590_s2 + $0xe0] sm:$0xff]  ;;  %v2085_v19 = vld [vmem:[%s3590_s2 + $0x1f0] sm:$0xff]  ;;  %v2051_v20 = vld [vmem:[%s3590_s2 + $0x128] sm:$0xff] }
  0xe6   : > { %v699_v21 = vadd.f32 %v693_v54, %v565_v14  ;;  %v745_v22 = vadd.f32 %v739_v55, %v636_v15  ;;  %v2014_v54 = vld [vmem:[%s3591_s3 + $0x10] sm:$0xff]  ;;  %v1047_v3 = vld [vmem:[%s3590_s2 + $0x20] sm:$0xff]  ;;  %v2019_v14 = vld [vmem:[%s3590_s2 + $0x58] sm:$0xff]  ;;  %1170 = vmatpush.msrb.mxu0 %v2051_v20 }
  0xe7   : > { %v1053_v55 = vld [vmem:[%s3590_s2 + $0x50] sm:$0xf]  ;;  %1200 = vmatpush.msrb.mxu1 %v2019_v14  ;;  %v2086_v15 = vld [vmem:[%s3590_s2 + $0x1f8] sm:$0xff]  ;;  %v2139_v20 = vld [vmem:[%s3590_s2 + $0x340] sm:$0xff] }
  0xe8   : > { %1171 = vmatpush.msrb.mxu0 %v2050_v24 }
  0xe9   : > { %2117 = vmatpush.msk.msra.mxu1 %vm867_vm4, %v2116_v17  ;;  %v2140_v17 = vld [vmem:[%s3590_s2 + $0x348] sm:$0xff] }
  0xec   : > { %v847_v5 = vpop.f32.mrf.mxu3  ;;  %v801_v18 = vpop.f32.mrf.mxu2 }
  0xed   : > { %v900_v60 = vpop.f32.mrf.mxu0  ;;  %v946_v61 = vpop.f32.mrf.mxu1  ;;  %v807_v30 = vadd.f32 %v801_v18, %v699_v21  ;;  %v853_v32 = vadd.f32 %v847_v5, %v745_v22  ;;  %v2034_v5 = vld [vmem:[%s3590_s2 + $0xd0] sm:$0xff]  ;;  %v2032_v18 = vld [vmem:[%s3590_s2 + $0xc0] sm:$0xff]  ;;  %v2031_v22 = vld [vmem:[%s3590_s2 + $0xb8] sm:$0xff] }
  0xee   : > { %v912_v62 = vadd.f32 %v900_v60, %v804_v57  ;;  %v958_v63 = vadd.f32 %v946_v61, %v850_v58  ;;  %v1051_v57 = vld [vmem:[%s3590_s2 + $0x40] sm:$0xff]  ;;  %v2038_v58 = vld [vmem:[%s3590_s2 + $0xf0] sm:$0xff]  ;;  %v2037_v60 = vld [vmem:[%s3590_s2 + $0xe8] sm:$0xff] }
  0xef   : > { %v967_v61 = vld [vmem:[%s3591_s3 + $0x8] sm:$0x3f]  ;;  %v2115_v21 = vld [vmem:[%s3590_s2 + $0x2b0] sm:$0xff] }
  0xf0   : > { %v2911_v1 = vmax.f32 %v912_v62, %v958_v63  ;;  %v2015_v62 = vld [vmem:[%s3591_s3 + $0x18] sm:$0x3f]  ;;  %v1049_v63 = vld [vmem:[%s3590_s2 + $0x30] sm:$0xff]  ;;  %1363 = vmatpush.msra.mxu1 %v2115_v21 }
  0xf1   : > { %v2130_v21 = vld [vmem:[%s3590_s2 + $0x310] sm:$0xf] }
  0xf2   : > { %1364 = vmatpush.msra.mxu1 %v2114_v4  ;;  %v2138_v4 = vld [vmem:[%s3590_s2 + $0x338] sm:$0xff] }
  0xf4   : > { %v909_v26 = vpop.f32.mrf.mxu3 }
  0xf5   : > { %v949_v2 = vpop.f32.mrf.mxu1  ;;  %v903_v6 = vpop.f32.mrf.mxu0  ;;  %v915_v36 = vadd.f32 %v909_v26, %v807_v30  ;;  %v2083_v26 = vld [vmem:[%s3590_s2 + $0x1e0] sm:$0xff]  ;;  %v2082_v30 = vld [vmem:[%s3590_s2 + $0x1d8] sm:$0xff] }
  0xf6   : > { %v913_v45 = vadd.f32 %v903_v6, %v805_v35  ;;  %v959_v46 = vadd.f32 %v949_v2, %v851_v31  ;;  %v2035_v2 = vld [vmem:[%s3590_s2 + $0xd8] sm:$0xff]  ;;  %v2081_v35 = vld [vmem:[%s3590_s2 + $0x1d0] sm:$0xff]  ;;  %v2047_v31 = vld [vmem:[%s3590_s2 + $0x108] sm:$0xff] }
  0xf7   : > { %v1046_v6 = vld [vmem:[%s3590_s2 + $0x18] sm:$0xff] }
  0xf8   : > { %v963_v51 = vmax.f32 %v913_v45, %v959_v46  ;;  %v2070_v45 = vld [vmem:[%s3590_s2 + $0x190] sm:$0xff]  ;;  %v2109_v46 = vld [vmem:[%s3590_s2 + $0x280] sm:$0xff] }
  0xfd   : > { %v952_v10 = vpop.f32.mrf.mxu1  ;;  %v906_v27 = vpop.f32.mrf.mxu0 }
  0xfe   : > { %v914_v37 = vadd.f32 %v906_v27, %v806_v28  ;;  %v960_v40 = vadd.f32 %v952_v10, %v852_v29  ;;  %v2088_v10 = vld [vmem:[%s3590_s2 + $0x208] sm:$0xf]  ;;  %v2049_v27 = vld [vmem:[%s3590_s2 + $0x118] sm:$0xff]  ;;  %v2074_v28 = vld [vmem:[%s3590_s2 + $0x1b0] sm:$0xf] }
  0xff   : > { %v2113_v29 = vld [vmem:[%s3590_s2 + $0x2a0] sm:$0xff]  ;;  %1172 = vmatpush.msrb.mxu0 %v2049_v27 }
 0x100   : > { %v964_v49 = vmax.f32 %v914_v37, %v960_v40  ;;  %1365 = vmatpush.msra.mxu1 %v2113_v29  ;;  %v2080_v37 = vld [vmem:[%s3590_s2 + $0x1c8] sm:$0xff]  ;;  %v2102_v40 = vld [vmem:[%s3590_s2 + $0x260] sm:$0xf] }
 0x101   : > { %v2128_v29 = vld [vmem:[%s3590_s2 + $0x300] sm:$0xff] }
 0x102   : > { %1366 = vmatpush.msra.mxu1 %v2112_v34  ;;  %v2127_v34 = vld [vmem:[%s3590_s2 + $0x2f8] sm:$0xff] }
 0x105   : > { %v955_v53 = vpop.f32.mrf.mxu1 }
 0x106   : > { %v961_v41 = vadd.f32 %v955_v53, %v853_v32  ;;  %v2048_v32 = vld [vmem:[%s3590_s2 + $0x110] sm:$0xff]  ;;  %v2072_v53 = vld [vmem:[%s3590_s2 + $0x1a0] sm:$0xff] }
 0x107   : > { %1173 = vmatpush.msrb.mxu0 %v2048_v32 }
 0x108   : > { %v965_v47 = vmax.f32 %v915_v36, %v961_v41  ;;  %v2111_v36 = vld [vmem:[%s3590_s2 + $0x290] sm:$0xff]  ;;  %v2071_v41 = vld [vmem:[%s3590_s2 + $0x198] sm:$0xff] }
 0x109   : > { %1174 = vmatpush.msrb.mxu0 %v2047_v31  ;;  %1367 = vmatpush.msra.mxu1 %v2111_v36  ;;  %v2126_v31 = vld [vmem:[%s3590_s2 + $0x2f0] sm:$0xff]  ;;  %v2125_v36 = vld [vmem:[%s3590_s2 + $0x2e8] sm:$0xff] }
 0x10a   : > { %2011 = vmatpush.msk.msra.mxu2 %vm867_vm4, %v965_v47  ;;  %2016 = vmatpush.msk.msrb.mxu3 %vm867_vm4, %v965_v47  ;;  %v2078_v47 = vld [vmem:[%s3590_s2 + $0x1b8] sm:$0xff] }
 0x10b   : > { %2103 = vmatpush.msk.msra.mxu0 %vm867_vm4, %v2102_v40  ;;  %1368 = vmatpush.msra.mxu1 %v2110_v42 }
 0x10c   : > { %991 = vmatpush.msra.mxu2 %v964_v49  ;;  %1023 = vmatpush.msrb.mxu3 %v964_v49  ;;  %v2069_v49 = vld [vmem:[%s3590_s2 + $0x188] sm:$0xff] }
 0x10d   : > { %1323 = vmatpush.msra.mxu0 %v2101_v44  ;;  %1369 = vmatpush.msra.mxu1 %v2109_v46  ;;  %v2120_v46 = vld [vmem:[%s3590_s2 + $0x2c0] sm:$0xff] }
 0x10e   : > { %992 = vmatpush.msra.mxu2 %v963_v51  ;;  %1024 = vmatpush.msrb.mxu3 %v963_v51  ;;  %v2099_v51 = vld [vmem:[%s3590_s2 + $0x248] sm:$0xff] }
 0x10f   : > { %1324 = vmatpush.msra.mxu0 %v2100_v48  ;;  %1370 = vmatpush.msra.mxu1 %v2108_v50 }
 0x110   : > { %993 = vmatpush.msra.mxu2 %v2911_v1  ;;  %1025 = vmatpush.msrb.mxu3 %v2911_v1  ;;  %v1048_v1 = vld [vmem:[%s3590_s2 + $0x28] sm:$0xff] }
 0x111   : > { %2012 = vmatmul.msk.f32.vlgmr.msra.gmra.mxu2 %vm968_vm5, %v966_v52  ;;  %2017 = vmatmul.msk.f32.vlgmr.msrb.gmra.mxu3 %vm968_vm5, %v2014_v54  ;;  %v2068_v52 = vld [vmem:[%s3590_s2 + $0x180] sm:$0xff]  ;;  %v2107_v54 = vld [vmem:[%s3590_s2 + $0x270] sm:$0xff] }
 0x112   : > { %2044 = vmatpush.msk.msra.mxu3 %vm867_vm4, %v1053_v55  ;;  %2041 = vmatpush.msk.msrb.mxu2 %vm867_vm4, %v2040_v56  ;;  %v2098_v55 = vld [vmem:[%s3590_s2 + $0x240] sm:$0xff]  ;;  %v2067_v56 = vld [vmem:[%s3590_s2 + $0x178] sm:$0xff] }
 0x113   : > { %1325 = vmatpush.msra.mxu0 %v2099_v51  ;;  %1371 = vmatpush.msra.mxu1 %v2107_v54 }
 0x114   : > { %1127 = vmatpush.msra.mxu3 %v1052_v38  ;;  %1097 = vmatpush.msrb.mxu2 %v2039_v39  ;;  %v2106_v38 = vld [vmem:[%s3590_s2 + $0x268] sm:$0xff]  ;;  %v2097_v39 = vld [vmem:[%s3590_s2 + $0x238] sm:$0xff] }
 0x115   : > { %1326 = vmatpush.msra.mxu0 %v2098_v55  ;;  %1372 = vmatpush.msra.mxu1 %v2106_v38  ;;  %v2161_v38 = vld [vmem:[%s3595_s7 + $0x90] sm:$0xff] }
 0x116   : > { %1128 = vmatpush.msra.mxu3 %v1051_v57  ;;  %1098 = vmatpush.msrb.mxu2 %v2038_v58  ;;  %v2066_v57 = vld [vmem:[%s3590_s2 + $0x170] sm:$0xff] }
 0x117   : > { %v2096_v58 = vld [vmem:[%s3590_s2 + $0x230] sm:$0xff]  ;;  %1327 = vmatpush.msra.mxu0 %v2097_v39 }
 0x118   : > { %1129 = vmatpush.msra.mxu3 %v1050_v59  ;;  %1099 = vmatpush.msrb.mxu2 %v2037_v60  ;;  %v2065_v59 = vld [vmem:[%s3590_s2 + $0x168] sm:$0xff] }
 0x119   : > { %2013 = vmatmul.msk.f32.gmra.mxu2 %vm968_vm5, %v967_v61  ;;  %2018 = vmatmul.msk.f32.gmra.mxu3 %vm968_vm5, %v2015_v62  ;;  %v2095_v60 = vld [vmem:[%s3590_s2 + $0x228] sm:$0xff]  ;;  %v2064_v61 = vld [vmem:[%s3590_s2 + $0x160] sm:$0xff] }
 0x11a   : > { %1130 = vmatpush.msra.mxu3 %v1049_v63  ;;  %1100 = vmatpush.msrb.mxu2 %v2036_v0  ;;  %v2094_v62 = vld [vmem:[%s3590_s2 + $0x220] sm:$0xff]  ;;  %v2093_v0 = vld [vmem:[%s3590_s2 + $0x218] sm:$0xff] }
 0x11b   : > { %1328 = vmatpush.msra.mxu0 %v2096_v58  ;;  %v2255_v63 = vld [vmem:[%s3593_s5] ss:$0 sm:$0xff] }
 0x11c   : > { %1131 = vmatpush.msra.mxu3 %v1048_v1  ;;  %1101 = vmatpush.msrb.mxu2 %v2035_v2 }
 0x11d   : > { %1329 = vmatpush.msra.mxu0 %v2095_v60  ;;  %v2159_v60 = vld [vmem:[%s3595_s7 + $0x80] sm:$0xff] }
 0x11e   : > { %1132 = vmatpush.msra.mxu3 %v1047_v3  ;;  %1102 = vmatpush.msrb.mxu2 %v2034_v5  ;;  %v2092_v3 = vld [vmem:[%s3590_s2 + $0x210] sm:$0xff] }
 0x11f   : > { %1330 = vmatpush.msra.mxu0 %v2094_v62 }
 0x120   : > { %1133 = vmatpush.msra.mxu3 %v1046_v6  ;;  %1103 = vmatpush.msrb.mxu2 %v2033_v13  ;;  %v2142_v13 = vld [vmem:[%s3590_s2 + $0x358] sm:$0xff] }
 0x121   : > { %1331 = vmatpush.msra.mxu0 %v2093_v0  ;;  %v2156_v0 = vld [vmem:[%s3595_s7 + $0x68] sm:$0xff] }
 0x122   : > { %1134 = vmatpush.msra.mxu3 %v1045_v7  ;;  %1104 = vmatpush.msrb.mxu2 %v2032_v18 }
 0x123   : > { %1332 = vmatpush.msra.mxu0 %v2092_v3 }
 0x124   : > { %1135 = vmatpush.msra.mxu3 %v1044_v8  ;;  %1105 = vmatpush.msrb.mxu2 %v2031_v22  ;;  %v2144_v8 = vld [vmem:[%s3590_s2 + $0x368] sm:$0xf] }
 0x126   : > { %1136 = vmatpush.msra.mxu3 %v1043_v9  ;;  %1106 = vmatpush.msrb.mxu2 %v2030_v25  ;;  %v2143_v9 = vld [vmem:[%s3590_s2 + $0x360] sm:$0xff]  ;;  %v2129_v25 = vld [vmem:[%s3590_s2 + $0x308] sm:$0xff] }
 0x128   : > { %2089 = vmatpush.msk.msrb.mxu3 %vm867_vm4, %v2088_v10  ;;  %2075 = vmatpush.msk.msra.mxu2 %vm867_vm4, %v2074_v28  ;;  %v2137_v28 = vld [vmem:[%s3590_s2 + $0x330] sm:$0xff] }
 0x12a   : > { %1276 = vmatpush.msrb.mxu3 %v2087_v11  ;;  %1236 = vmatpush.msra.mxu2 %v2073_v33  ;;  %v2136_v33 = vld [vmem:[%s3590_s2 + $0x328] sm:$0xff] }
 0x12c   : > { %1277 = vmatpush.msrb.mxu3 %v2086_v15  ;;  %1237 = vmatpush.msra.mxu2 %v2072_v53  ;;  %v2141_v15 = vld [vmem:[%s3590_s2 + $0x350] sm:$0xff]  ;;  %v2134_v53 = vld [vmem:[%s3590_s2 + $0x318] sm:$0xff] }
 0x12e   : > { %1278 = vmatpush.msrb.mxu3 %v2085_v19  ;;  %1238 = vmatpush.msra.mxu2 %v2071_v41  ;;  %v2123_v41 = vld [vmem:[%s3590_s2 + $0x2d8] sm:$0xff] }
 0x130   : > { %1279 = vmatpush.msrb.mxu3 %v2084_v23  ;;  %1239 = vmatpush.msra.mxu2 %v2070_v45  ;;  %v2121_v45 = vld [vmem:[%s3590_s2 + $0x2c8] sm:$0xff] }
 0x132   : > { %1280 = vmatpush.msrb.mxu3 %v2083_v26  ;;  %1240 = vmatpush.msra.mxu2 %v2069_v49 }
 0x134   : > { %1281 = vmatpush.msrb.mxu3 %v2082_v30  ;;  %1241 = vmatpush.msra.mxu2 %v2068_v52 }
 0x136   : > { %1282 = vmatpush.msrb.mxu3 %v2081_v35  ;;  %1242 = vmatpush.msra.mxu2 %v2067_v56  ;;  %v2135_v35 = vld [vmem:[%s3590_s2 + $0x320] sm:$0xff]  ;;  %v2162_v56 = vld [vmem:[%s3595_s7 + $0x98] sm:$0xff] }
 0x138   : > { %1283 = vmatpush.msrb.mxu3 %v2080_v37  ;;  %1243 = vmatpush.msra.mxu2 %v2066_v57  ;;  %v2124_v37 = vld [vmem:[%s3590_s2 + $0x2e0] sm:$0xff] }
 0x13a   : > { %1284 = vmatpush.msrb.mxu3 %v2079_v43  ;;  %1244 = vmatpush.msra.mxu2 %v2065_v59  ;;  %v2122_v43 = vld [vmem:[%s3590_s2 + $0x2d0] sm:$0xff]  ;;  %v2160_v59 = vld [vmem:[%s3595_s7 + $0x88] sm:$0xff] }
 0x13c   : > { %1285 = vmatpush.msrb.mxu3 %v2078_v47  ;;  %1245 = vmatpush.msra.mxu2 %v2064_v61  ;;  %v2158_v61 = vld [vmem:[%s3595_s7 + $0x78] sm:$0xff] }
 0x194   : > { %v995_v1 = vpop.f32.mrf.mxu2  ;;  %v1027_v2 = vpop.f32.mrf.mxu3 }
 0x195   : > { %v1033_v5 = vmax.f32 %v995_v1, %v1027_v2 }
 0x197   : > { %v1039_v6 = vadd.f32 %v2255_v63, %v1033_v5  ;;  %v2155_v5 = vld [vmem:[%s3595_s7 + $0x60] sm:$0xff] }
 0x199   : > { %v3208_v7 = vmax.f32 %v1039_v6, 0.0  ;;  %v2154_v6 = vld [vmem:[%s3595_s7 + $0x58] sm:$0xff] }
 0x19b   : > { %2045 = vmatmul.msk.f32.vlgmr.msra.gmra.mxu3 %vm1083_vm6, %v3208_v7  ;;  %2062 = vmatmul.msk.f32.vlgmr.msrb.gmra.mxu1 %vm1083_vm6, %v3208_v7  ;;  %v1080_v18 = vrot.slane %v3208_v7, 1  ;;  %v1220_v26 = vrot.slane %v3208_v7, 2  ;;  %v1307_v27 = vrot.slane %v3208_v7, 3  ;;  %v1394_v42 = vrot.slane %v3208_v7, 4 }
 0x19c   : > { %v998_v10 = vpop.f32.mrf.mxu2  ;;  %v1030_v11 = vpop.f32.mrf.mxu3  ;;  %2145 = vmatpush.msk.msra.mxu3 %vm867_vm4, %v2144_v8  ;;  %v2153_v8 = vld [vmem:[%s3595_s7 + $0x50] sm:$0xff] }
 0x19d   : > { %v1034_v12 = vmax.f32 %v998_v10, %v1030_v11 }
 0x19e   : > { %1450 = vmatpush.msra.mxu3 %v2143_v9 }
 0x19f   : > { %v1040_v14 = vadd.f32 %v2255_v63, %v1034_v12  ;;  %v2157_v63 = vld [vmem:[%s3595_s7 + $0x70] sm:$0xff]  ;;  %v2196_v12 = vld [vmem:[%s3595_s7 + $0x188] sm:$0xff] }
 0x1a0   : > { %1451 = vmatpush.msra.mxu3 %v2142_v13 }
 0x1a1   : > { %v1042_v16 = vmax.f32 %v1040_v14, 0.0 }
 0x1a2   : > { %1452 = vmatpush.msra.mxu3 %v2141_v15 }
 0x1a3   : > { %2046 = vmatmul.msk.f32.gmra.mxu3 %vm1083_vm6, %v1042_v16  ;;  %2063 = vmatmul.msk.f32.gmra.mxu1 %vm1083_vm6, %v1042_v16  ;;  %v1081_v19 = vrot.slane %v1042_v16, 1  ;;  %v1221_v23 = vrot.slane %v1042_v16, 2  ;;  %v1308_v24 = vrot.slane %v1042_v16, 3  ;;  %v1395_v40 = vrot.slane %v1042_v16, 4 }
 0x1a4   : > { %1453 = vmatpush.msra.mxu3 %v2140_v17 }
 0x1a5   : > { %v1082_v22 = vsel %vm484_vm0, %v1080_v18, %v1081_v19  ;;  %v1222_v30 = vsel %vm651_vm2, %v1220_v26, %v1221_v23  ;;  %v1309_v32 = vsel %vm759_vm3, %v1307_v27, %v1308_v24  ;;  %v1396_v44 = vsel %vm867_vm4, %v1394_v42, %v1395_v40  ;;  %v1533_v42 = vld [vmem:[%s3595_s7 + $0x8] sm:$0xff] }
 0x1a6   : > { %2042 = vmatmul.msk.f32.vlgmr.msrb.gmra.mxu2 %vm1083_vm6, %v1082_v22  ;;  %2059 = vmatmul.msk.f32.vlgmr.msrb.gmra.mxu0 %vm1083_vm6, %v1082_v22 }
 0x1a7   : > { %1454 = vmatpush.msra.mxu3 %v2139_v20  ;;  %2131 = vmatpush.msk.msrb.mxu2 %vm867_vm4, %v2130_v21 }
 0x1a9   : > { %1455 = vmatpush.msra.mxu3 %v2138_v4  ;;  %1410 = vmatpush.msrb.mxu2 %v2129_v25 }
 0x1ab   : > { %2090 = vmatmul.msk.f32.vlgmr.msrb.gmra.mxu3 %vm1083_vm6, %v1222_v30  ;;  %2118 = vmatmul.msk.f32.vlgmr.msra.gmra.mxu1 %vm1083_vm6, %v1309_v32 }
 0x1ac   : > { %1456 = vmatpush.msra.mxu3 %v2137_v28  ;;  %1411 = vmatpush.msrb.mxu2 %v2128_v29 }
 0x1ae   : > { %2043 = vmatmul.msk.f32.gmra.mxu2 %vm1083_vm6, %v1081_v19  ;;  %2060 = vmatmul.msk.f32.gmra.mxu0 %vm1083_vm6, %v1081_v19 }
 0x1af   : > { %1457 = vmatpush.msra.mxu3 %v2136_v33  ;;  %1412 = vmatpush.msrb.mxu2 %v2127_v34  ;;  %v2150_v33 = vld [vmem:[%s3592_s4 + $0x8] sm:$0x1f] }
 0x1b0   : > { %v1541_v34 = vld [vmem:[%s3595_s7 + $0x48] sm:$0xff] }
 0x1b1   : > { %1458 = vmatpush.msra.mxu3 %v2135_v35  ;;  %1413 = vmatpush.msrb.mxu2 %v2126_v31  ;;  %v1540_v35 = vld [vmem:[%s3595_s7 + $0x40] sm:$0xff]  ;;  %v1539_v31 = vld [vmem:[%s3595_s7 + $0x38] sm:$0xff] }
 0x1b3   : > { %2091 = vmatmul.msk.f32.gmra.mxu3 %vm1083_vm6, %v1221_v23  ;;  %2119 = vmatmul.msk.f32.gmra.mxu1 %vm1083_vm6, %v1308_v24 }
 0x1b4   : > { %1459 = vmatpush.msra.mxu3 %v2134_v53  ;;  %1414 = vmatpush.msrb.mxu2 %v2125_v36  ;;  %v1538_v53 = vld [vmem:[%s3595_s7 + $0x30] sm:$0xff]  ;;  %v1537_v36 = vld [vmem:[%s3595_s7 + $0x28] sm:$0xff] }
 0x1b6   : > { %2076 = vmatmul.msk.f32.vlgmr.msra.gmra.mxu2 %vm1083_vm6, %v1222_v30  ;;  %2104 = vmatmul.msk.f32.vlgmr.msra.gmra.mxu0 %vm1083_vm6, %v1309_v32  ;;  %v1471_v32 = vld [vmem:[%s3592_s4] sm:$0x1f] }
 0x1b7   : > { %1415 = vmatpush.msrb.mxu2 %v2124_v37  ;;  %v1536_v37 = vld [vmem:[%s3595_s7 + $0x20] sm:$0xff] }
 0x1b9   : > { %1416 = vmatpush.msrb.mxu2 %v2123_v41  ;;  %v1534_v41 = vld [vmem:[%s3595_s7 + $0x10] sm:$0xff] }
 0x1bb   : > { %2146 = vmatmul.msk.f32.vlgmr.msra.gmra.mxu3 %vm1083_vm6, %v1396_v44  ;;  %1417 = vmatpush.msrb.mxu2 %v2122_v43  ;;  %v2174_v43 = vld [vmem:[%s3595_s7 + $0xe8] sm:$0xff] }
 0x1bd   : > { %1418 = vmatpush.msrb.mxu2 %v2121_v45  ;;  %v2172_v45 = vld [vmem:[%s3595_s7 + $0xd8] sm:$0xff] }
 0x1be   : > { %2077 = vmatmul.msk.f32.gmra.mxu2 %vm1083_vm6, %v1221_v23  ;;  %2105 = vmatmul.msk.f32.gmra.mxu0 %vm1083_vm6, %v1308_v24 }
 0x1bf   : > { %1419 = vmatpush.msrb.mxu2 %v2120_v46  ;;  %v1532_v46 = vld [vmem:[%s3595_s7] sm:$0xff] }
 0x1c1   : > { %1564 = vmatpush.msra.mxu2 %v2162_v56  ;;  %v2182_v56 = vld [vmem:[%s3595_s7 + $0x120] sm:$0xff] }
 0x1c3   : > { %2147 = vmatmul.msk.f32.gmra.mxu3 %vm1083_vm6, %v1395_v40  ;;  %1565 = vmatpush.msra.mxu2 %v2161_v38  ;;  %v2168_v38 = vld [vmem:[%s3595_s7 + $0xb8] sm:$0xff] }
 0x1c5   : > { %1566 = vmatpush.msra.mxu2 %v2160_v59  ;;  %v2192_v59 = vld [vmem:[%s3595_s7 + $0x168] sm:$0xff] }
 0x1c6   : > { %2132 = vmatmul.msk.f32.vlgmr.msrb.gmra.mxu2 %vm1083_vm6, %v1396_v44  ;;  %v2173_v44 = vld [vmem:[%s3595_s7 + $0xe0] sm:$0xff] }
 0x1c7   : > { %1567 = vmatpush.msra.mxu2 %v2159_v60  ;;  %v2191_v60 = vld [vmem:[%s3595_s7 + $0x160] sm:$0xff] }
 0x1c9   : > { %1568 = vmatpush.msra.mxu2 %v2158_v61  ;;  %v2180_v61 = vld [vmem:[%s3595_s7 + $0x110] sm:$0xff] }
 0x1cb   : > { %1569 = vmatpush.msra.mxu2 %v2157_v63  ;;  %v2179_v63 = vld [vmem:[%s3595_s7 + $0x108] sm:$0xff] }
 0x1cd   : > { %1570 = vmatpush.msra.mxu2 %v2156_v0  ;;  %v2165_v0 = vld [vmem:[%s3595_s7 + $0xa0] sm:$0xff] }
 0x1ce   : > { %2133 = vmatmul.msk.f32.gmra.mxu2 %vm1083_vm6, %v1395_v40  ;;  %v1535_v40 = vld [vmem:[%s3595_s7 + $0x18] sm:$0xff] }
 0x1cf   : > { %1571 = vmatpush.msra.mxu2 %v2155_v5  ;;  %v2188_v5 = vld [vmem:[%s3595_s7 + $0x148] sm:$0xff] }
 0x1d1   : > { %1572 = vmatpush.msra.mxu2 %v2154_v6  ;;  %v2177_v6 = vld [vmem:[%s3595_s7 + $0xf8] sm:$0xff] }
 0x1d3   : > { %1573 = vmatpush.msra.mxu2 %v2153_v8  ;;  %v2176_v8 = vld [vmem:[%s3595_s7 + $0xf0] sm:$0xff] }
 0x1d5   : > { %1690 = vmatpush.msrb.mxu2 %v2196_v12  ;;  %v1719_v12 = vld [vmem:[%s3597_s9 + $0x58] sm:$0xff] }
 0x218   : > { %v1202_v50 = vpop.f32.mrf.mxu1 }
 0x21e   : > { %v1138_v47 = vpop.f32.mrf.mxu3 }
 0x220   : > { %v1205_v39 = vpop.f32.mrf.mxu1 }
 0x223   : > { %v1176_v51 = vpop.f32.mrf.mxu0 }
 0x224   : > { %v1203_v13 = vadd.f32 %v1202_v50, %v1176_v51  ;;  %v2170_v50 = vld [vmem:[%s3595_s7 + $0xc8] sm:$0xff]  ;;  %v2195_v51 = vld [vmem:[%s3595_s7 + $0x180] sm:$0xff] }
 0x225   : > { %1691 = vmatpush.msrb.mxu2 %v2195_v51 }
 0x226   : > { %v1141_v48 = vpop.f32.mrf.mxu3 }
 0x228   : > { %v1374_v1 = vpop.f32.mrf.mxu1 }
 0x229   : > { %v1108_v49 = vpop.f32.mrf.mxu2 }
 0x22a   : > { %v1139_v9 = vadd.f32 %v1138_v47, %v1108_v49  ;;  %v2185_v47 = vld [vmem:[%s3595_s7 + $0x138] sm:$0xff]  ;;  %v2184_v49 = vld [vmem:[%s3595_s7 + $0x130] sm:$0xff] }
 0x22b   : > { %v1179_v57 = vpop.f32.mrf.mxu0 }
 0x22c   : > { %v1206_v10 = vadd.f32 %v1205_v39, %v1179_v57  ;;  %v2193_v39 = vld [vmem:[%s3595_s7 + $0x170] sm:$0xff]  ;;  %v2181_v57 = vld [vmem:[%s3595_s7 + $0x118] sm:$0xff] }
 0x22e   : > { %v1287_v52 = vpop.f32.mrf.mxu3 }
 0x22f   : > { %v1293_v17 = vadd.f32 %v1287_v52, %v1203_v13  ;;  %v2183_v52 = vld [vmem:[%s3595_s7 + $0x128] sm:$0xff]  ;;  %v1718_v13 = vld [vmem:[%s3597_s9 + $0x50] sm:$0xff] }
 0x230   : > { %v1377_v18 = vpop.f32.mrf.mxu1 }
 0x231   : > { %v1111_v54 = vpop.f32.mrf.mxu2  ;;  %v1380_v4 = vadd.f32 %v1374_v1, %v1293_v17  ;;  %v2190_v1 = vld [vmem:[%s3595_s7 + $0x158] sm:$0xff] }
 0x232   : > { %v1142_v11 = vadd.f32 %v1141_v48, %v1111_v54  ;;  %v2171_v48 = vld [vmem:[%s3595_s7 + $0xd0] sm:$0xff]  ;;  %v2169_v54 = vld [vmem:[%s3595_s7 + $0xc0] sm:$0xff] }
 0x233   : > { %v1334_v2 = vpop.f32.mrf.mxu0 }
 0x236   : > { %v1290_v58 = vpop.f32.mrf.mxu3 }
 0x237   : > { %v1294_v14 = vadd.f32 %v1290_v58, %v1206_v10  ;;  %v2167_v58 = vld [vmem:[%s3595_s7 + $0xb0] sm:$0xff]  ;;  %v1721_v10 = vld [vmem:[%s3597_s9 + $0x68] sm:$0xff] }
 0x239   : > { %v1247_v55 = vpop.f32.mrf.mxu2  ;;  %v1381_v21 = vadd.f32 %v1377_v18, %v1294_v14  ;;  %v1717_v14 = vld [vmem:[%s3597_s9 + $0x48] sm:$0xff] }
 0x23a   : > { %v1253_v15 = vadd.f32 %v1247_v55, %v1139_v9  ;;  %v2194_v55 = vld [vmem:[%s3595_s7 + $0x178] sm:$0xff]  ;;  %v1722_v9 = vld [vmem:[%s3597_s9 + $0x70] sm:$0xff] }
 0x23b   : > { %v1337_v19 = vpop.f32.mrf.mxu0  ;;  %1692 = vmatpush.msrb.mxu2 %v2194_v55  ;;  %1729 = vmatpush.msrb.mxu3 %v1722_v9  ;;  %v1751_v55 = vld [vmem:[%s3599_s11 + $0x10] sm:$0xff] }
 0x23c   : > { %v1340_v22 = vadd.f32 %v1334_v2, %v1253_v15  ;;  %v2189_v2 = vld [vmem:[%s3595_s7 + $0x150] sm:$0xff]  ;;  %v2256_v15 = vld [vmem:[%s3594_s6] ss:$0 sm:$0xff] }
 0x23d   : > { %1693 = vmatpush.msrb.mxu2 %v2193_v39  ;;  %1730 = vmatpush.msrb.mxu3 %v1721_v10  ;;  %v1723_v39 = vld [vmem:[%s3598_s10] sm:$0x1] }
 0x23e   : > { %v1461_v3 = vpop.f32.mrf.mxu3 }
 0x23f   : > { %v1467_v28 = vadd.f32 %v1461_v3, %v1380_v4  ;;  %1694 = vmatpush.msrb.mxu2 %v2192_v59  ;;  %v2178_v3 = vld [vmem:[%s3595_s7 + $0x100] sm:$0xff] }
 0x240   : > { %v1716_v4 = vld [vmem:[%s3597_s9 + $0x40] sm:$0xff] }
 0x241   : > { %v1250_v62 = vpop.f32.mrf.mxu2  ;;  %1695 = vmatpush.msrb.mxu2 %v2191_v60  ;;  %v1760_v60 = vld [vmem:[%s3600_s12] sm:$0x1] }
 0x242   : > { %v1254_v16 = vadd.f32 %v1250_v62, %v1142_v11  ;;  %v2166_v62 = vld [vmem:[%s3595_s7 + $0xa8] sm:$0xff]  ;;  %v1720_v11 = vld [vmem:[%s3597_s9 + $0x60] sm:$0xff] }
 0x243   : > { %1696 = vmatpush.msrb.mxu2 %v2190_v1  ;;  %1731 = vmatpush.msrb.mxu3 %v1720_v11 }
 0x244   : > { %v1341_v23 = vadd.f32 %v1337_v19, %v1254_v16 }
 0x245   : > { %1697 = vmatpush.msrb.mxu2 %v2189_v2  ;;  %1732 = vmatpush.msrb.mxu3 %v1719_v12 }
 0x246   : > { %v1464_v20 = vpop.f32.mrf.mxu3 }
 0x247   : > { %v1468_v25 = vadd.f32 %v1464_v20, %v1381_v21  ;;  %1698 = vmatpush.msrb.mxu2 %v2188_v5  ;;  %1733 = vmatpush.msrb.mxu3 %v1718_v13 }
 0x249   : > { %v1421_v7 = vpop.f32.mrf.mxu2  ;;  %1734 = vmatpush.msrb.mxu3 %v1717_v14 }
 0x24a   : > { %v1427_v26 = vadd.f32 %v1421_v7, %v1340_v22  ;;  %v2187_v7 = vld [vmem:[%s3595_s7 + $0x140] sm:$0xff] }
 0x24b   : > { %1699 = vmatpush.msrb.mxu2 %v2187_v7  ;;  %1735 = vmatpush.msrb.mxu3 %v1716_v4 }
 0x24c   : > { %v1469_v30 = vmax.f32 %v1427_v26, %v1467_v28  ;;  %v1714_v26 = vld [vmem:[%s3597_s9 + $0x30] sm:$0xff]  ;;  %v1712_v28 = vld [vmem:[%s3597_s9 + $0x20] sm:$0xff] }
 0x251   : > { %v1424_v24 = vpop.f32.mrf.mxu2 }
 0x252   : > { %v1428_v27 = vadd.f32 %v1424_v24, %v1341_v23 }
 0x254   : > { %v1470_v29 = vmax.f32 %v1428_v27, %v1468_v25  ;;  %v1715_v25 = vld [vmem:[%s3597_s9 + $0x38] sm:$0xff]  ;;  %v1713_v27 = vld [vmem:[%s3597_s9 + $0x28] sm:$0xff] }
 0x255   : > { %1736 = vmatpush.msrb.mxu3 %v1715_v25 }
 0x256   : > { %2148 = vmatpush.msk.msrb.mxu0 %vm1476_vm7, %v1470_v29  ;;  %2151 = vmatpush.msk.msrb.mxu1 %vm1476_vm7, %v1470_v29  ;;  %v1711_v29 = vld [vmem:[%s3597_s9 + $0x18] sm:$0xff] }
 0x257   : > { %1737 = vmatpush.msrb.mxu3 %v1714_v26 }
 0x258   : > { %1495 = vmatpush.msrb.mxu0 %v1469_v30  ;;  %1520 = vmatpush.msrb.mxu1 %v1469_v30  ;;  %v1710_v30 = vld [vmem:[%s3597_s9 + $0x10] sm:$0xff] }
 0x259   : > { %2149 = vmatmul.msk.f32.vlgmr.msrb.gmra.mxu0 %vm1472_vm8, %v1471_v32  ;;  %2152 = vmatmul.msk.f32.vlgmr.msrb.gmra.mxu1 %vm1472_vm8, %v2150_v33  ;;  %v1709_v32 = vld [vmem:[%s3597_s9 + $0x8] sm:$0xff]  ;;  %v1708_v33 = vld [vmem:[%s3597_s9] sm:$0xff] }
 0x25a   : > { %1586 = vmatpush.msra.mxu1 %v1541_v34  ;;  %1620 = vmatpush.msra.mxu0 %v2174_v43  ;;  %v1759_v34 = vld [vmem:[%s3599_s11 + $0x50] sm:$0xf] }
 0x25b   : > { %1738 = vmatpush.msrb.mxu3 %v1713_v27 }
 0x25c   : > { %1587 = vmatpush.msra.mxu1 %v1540_v35  ;;  %1621 = vmatpush.msra.mxu0 %v2173_v44  ;;  %v1758_v35 = vld [vmem:[%s3599_s11 + $0x48] sm:$0xff] }
 0x25d   : > { %1739 = vmatpush.msrb.mxu3 %v1712_v28 }
 0x25e   : > { %1588 = vmatpush.msra.mxu1 %v1539_v31  ;;  %1622 = vmatpush.msra.mxu0 %v2172_v45  ;;  %v1757_v31 = vld [vmem:[%s3599_s11 + $0x40] sm:$0xff] }
 0x25f   : > { %1740 = vmatpush.msrb.mxu3 %v1711_v29 }
 0x260   : > { %1589 = vmatpush.msra.mxu1 %v1538_v53  ;;  %1623 = vmatpush.msra.mxu0 %v2171_v48  ;;  %v1756_v53 = vld [vmem:[%s3599_s11 + $0x38] sm:$0xff] }
 0x261   : > { %1741 = vmatpush.msrb.mxu3 %v1710_v30 }
 0x262   : > { %1590 = vmatpush.msra.mxu1 %v1537_v36  ;;  %1624 = vmatpush.msra.mxu0 %v2170_v50  ;;  %v1755_v36 = vld [vmem:[%s3599_s11 + $0x30] sm:$0xff]  ;;  %v1705_v50 = vld [vmem:[%s3596_s8] sm:$0x1] }
 0x263   : > { %1742 = vmatpush.msrb.mxu3 %v1709_v32 }
 0x264   : > { %1591 = vmatpush.msra.mxu1 %v1536_v37  ;;  %1625 = vmatpush.msra.mxu0 %v2169_v54  ;;  %v1754_v37 = vld [vmem:[%s3599_s11 + $0x28] sm:$0xff] }
 0x265   : > { %1743 = vmatpush.msrb.mxu3 %v1708_v33 }
 0x266   : > { %1592 = vmatpush.msra.mxu1 %v1535_v40  ;;  %1626 = vmatpush.msra.mxu0 %v2168_v38  ;;  %v1753_v40 = vld [vmem:[%s3599_s11 + $0x20] sm:$0xff] }
 0x267   : > { %v1749_v38 = vld [vmem:[%s3599_s11] sm:$0xff] }
 0x268   : > { %1593 = vmatpush.msra.mxu1 %v1534_v41  ;;  %1627 = vmatpush.msra.mxu0 %v2167_v58  ;;  %v1752_v41 = vld [vmem:[%s3599_s11 + $0x18] sm:$0xff] }
 0x26a   : > { %1594 = vmatpush.msra.mxu1 %v1533_v42  ;;  %1628 = vmatpush.msra.mxu0 %v2166_v62 }
 0x26c   : > { %1595 = vmatpush.msra.mxu1 %v1532_v46  ;;  %1629 = vmatpush.msra.mxu0 %v2165_v0 }
 0x26e   : > { %1655 = vmatpush.msrb.mxu1 %v2185_v47  ;;  %2199 = vmatpush.msk.msrb.mxu0 %vm867_vm4, %v1759_v34 }
 0x270   : > { %1656 = vmatpush.msrb.mxu1 %v2184_v49  ;;  %1773 = vmatpush.msrb.mxu0 %v1758_v35 }
 0x272   : > { %1657 = vmatpush.msrb.mxu1 %v2183_v52  ;;  %1774 = vmatpush.msrb.mxu0 %v1757_v31 }
 0x274   : > { %1658 = vmatpush.msrb.mxu1 %v2182_v56  ;;  %1775 = vmatpush.msrb.mxu0 %v1756_v53  ;;  %v1750_v56 = vld [vmem:[%s3599_s11 + $0x8] sm:$0xff] }
 0x276   : > { %1659 = vmatpush.msrb.mxu1 %v2181_v57  ;;  %1776 = vmatpush.msrb.mxu0 %v1755_v36 }
 0x278   : > { %1660 = vmatpush.msrb.mxu1 %v2180_v61  ;;  %1777 = vmatpush.msrb.mxu0 %v1754_v37 }
 0x27a   : > { %1661 = vmatpush.msrb.mxu1 %v2179_v63  ;;  %1778 = vmatpush.msrb.mxu0 %v1753_v40 }
 0x27c   : > { %1662 = vmatpush.msrb.mxu1 %v2178_v3  ;;  %1779 = vmatpush.msrb.mxu0 %v1752_v41 }
 0x27e   : > { %1663 = vmatpush.msrb.mxu1 %v2177_v6  ;;  %1780 = vmatpush.msrb.mxu0 %v1751_v55 }
 0x280   : > { %1664 = vmatpush.msrb.mxu1 %v2176_v8  ;;  %1781 = vmatpush.msrb.mxu0 %v1750_v56 }
 0x282   : > { %1782 = vmatpush.msrb.mxu0 %v1749_v38 }
 0x2d6   : > { %v1497_v16 = vpop.f32.mrf.mxu0  ;;  %v1522_v17 = vpop.f32.mrf.mxu1 }
 0x2d7   : > { %v1525_v18 = vmax.f32 %v1497_v16, %v1522_v17 }
 0x2d9   : > { %v1530_v19 = vadd.f32 %v2256_v15, %v1525_v18 }
 0x2db   : > { %v1531_v20 = vmax.f32 %v1530_v19, 0.0 }
 0x2dd   : > { %v1554_v21 = vrot.slane %v1531_v20, 1  ;;  %2164 = vmatmul.msk.f32.vlgmr.msra.gmra.mxu1 %vm1555_vm9, %v1531_v20  ;;  %v1611_v22 = vrot.slane %v1531_v20, 2  ;;  %v1646_v23 = vrot.slane %v1531_v20, 3  ;;  %v1681_v24 = vrot.slane %v1531_v20, 4 }
 0x2df   : > { %2163 = vmatmul.msk.f32.vlgmr.msra.gmra.mxu2 %vm1555_vm9, %v1554_v21  ;;  %2175 = vmatmul.msk.f32.vlgmr.msra.gmra.mxu0 %vm1555_vm9, %v1611_v22 }
 0x2e5   : > { %2186 = vmatmul.msk.f32.vlgmr.msrb.gmra.mxu1 %vm1555_vm9, %v1646_v23 }
 0x2e7   : > { %2197 = vmatmul.msk.f32.vlgmr.msrb.gmra.mxu2 %vm1555_vm9, %v1681_v24 }
 0x35a   : > { %v1597_v42 = vpop.f32.mrf.mxu1 }
 0x35c   : > { %v1631_v45 = vpop.f32.mrf.mxu0 }
 0x362   : > { %v1575_v43 = vpop.f32.mrf.mxu2  ;;  %v1666_v47 = vpop.f32.mrf.mxu1 }
 0x363   : > { %v1598_v44 = vadd.f32 %v1597_v42, %v1575_v43 }
 0x365   : > { %v1634_v46 = vadd.f32 %v1631_v45, %v1598_v44 }
 0x367   : > { %v1669_v48 = vadd.f32 %v1666_v47, %v1634_v46 }
 0x36a   : > { %v1701_v49 = vpop.f32.mrf.mxu2 }
 0x36b   : > { %v1704_v51 = vadd.f32 %v1701_v49, %v1669_v48 }
 0x36d   : > { %v1706_v52 = vadd.f32 %v1705_v50, %v1704_v51 }
 0x36f   : > { %v1707_v54 = vmax.f32 %v1706_v52, 0.0 }
 0x371   : > { %2198 = vmatmul.msk.f32.vlgmr.msrb.gmra.mxu3 %vm1724_vm10, %v1707_v54 }
 0x3f4   : > { %v1745_v57 = vpop.f32.mrf.mxu3 }
 0x3f5   : > { %v1746_v58 = vadd.f32 %v1745_v57, %v1723_v39 }
 0x3f7   : > { %v1748_v59 = vmax.f32 %v1746_v58, 0.0 }
 0x3f9   : > { %2200 = vmatmul.msk.f32.vlgmr.msrb.gmra.mxu0 %vm1083_vm6, %v1748_v59 }
 0x476   : > { %v1784_v61 = vpop.f32.mrf.mxu0 }
 0x477   : > { %v1785_v62 = vadd.f32 %v1784_v61, %v1760_v60 }
 0x479   : > { %1788 = vst.msk [vmem:[%s432_s21] sm:$0x1] %vm1787_vm11, %v1785_v62 }
 0x47a   : > { %2284 = shalt.err (!%p2281_p3)
}
 0x47b   : > { %2216 = dma.vmem_to_hbm [thread:$0]  (%p2429_p5), %s1801_s15, 16, %s1803_s22, %s1790_s23  }
 0x47c PF: > { %p2222_p4 = scmp.ge.s32.totalorder %s2319_s28, 2  ;;  %s1814_s20 = sand.u32 1, %s2307_s25  }
 0x47d   : > { %s1815_s21 = scalar_lea.sflag [#allocation3], %s1814_s20 }
 0x47e   : > { %p2219_p7 = pnand %p2222_p4, %p2433_p6 }
 0x480   : > { %p2220_p8 = pneg %p2219_p7 }
 0x482   : > { %2302 = dma.done.wait (%p2220_p8), %s1815_s21, 16  }
 0x483   : > { %2304 = vsyncadd (%p2220_p8), %s1815_s21, 4294967280  ;;  %s3613_s28 = sld [smem:[#allocation6_spill]]  ;;  %s3616_s25 = smov %s2311_s26 }
 0x484   : > { %s3614_s19 = sld [smem:[#allocation5_spill]] }
 0x485   : > { %s3615_s27 = sld [smem:[#allocation7_spill]] }
 0x489   : > { %p23_p9 = scmp.ge.s32.totalorder %s3613_s28, 4  }
 0x48a   : > { %s3617_s26 = smov %s3614_s19 }
 0x48b   :  { %25 = sbr.rel (!%p23_p9) target bundleno = 3 (0x3), region = 131 }
 0x490   :  { %1820 = vsyncpa [#allocation3], 1 }
 0x491   :  { %1822 = vsyncpa [#allocation3 + $0x1], 1 }

</bundles_post_ra>
